<compile_context>
chip_gen: v7x
topology: tpu7x:2x2x1
jax: 0.10.0
libtpu: 0.0.40
codegen_flags: <defaults>
</compile_context>

<pallas_src>
import math
from functools import partial

import jax
import jax.numpy as jnp
from jax.experimental import pallas as pl
from jax.experimental.pallas import tpu as pltpu

# ---------------- model hyper-parameters (match the PyTorch module) -----------
N_TRACK = 10
N_WAYPOINTS = 3
HIDDEN_DIM = 128
NUM_LAYERS = 4             # 1 input linear + (NUM_LAYERS-1) hidden linears + output head
HALF_DIM = 2 * N_TRACK     # 20 features per track side
INPUT_DIM = 4 * N_TRACK    # 40
OUTPUT_DIM = N_WAYPOINTS * 2   # 6
OUT_PAD = 128              # lane-dense padded output width (unmasked stores)
LN_EPS = 1e-5
INV_SQRT2 = 1.0 / math.sqrt(2.0)

INPUT_MEAN = jnp.array([0.2788, 0.2657], dtype=jnp.float32)
INPUT_STD = jnp.array([0.2064, 0.1944], dtype=jnp.float32)


# ---------------- elementwise helpers (run inside the kernel) -----------------
def _erf(x):
    # Abramowitz & Stegun 7.1.26 rational approximation (|err| < 1.5e-7).
    # exp() -> EUP; 1/(1+p*ax) uses EUP approximate reciprocal + one Newton step
    # so the full-precision divide never hits the VALU slot.
    a1, a2, a3, a4, a5 = 0.254829592, -0.284496736, 1.421413741, -1.453152027, 1.061405429
    p = 0.3275911
    ax = jnp.abs(x)
    d = 1.0 + p * ax
    t0 = pl.reciprocal(d, approx=True)        # EUP slot
    t = t0 * (2.0 - d * t0)                   # Newton refine -> ~f32-exact 1/d
    poly = ((((a5 * t + a4) * t + a3) * t + a2) * t + a1) * t
    y = 1.0 - poly * jnp.exp(-ax * ax)
    return jnp.where(x >= 0.0, y, -y)


def _gelu_exact(x):
    # PyTorch nn.GELU() default = exact erf GELU.
    return 0.5 * x * (1.0 + _erf(x * INV_SQRT2))


def _layernorm(x, gamma, beta):
    # var = E[x^2] - mu^2: one x*x pass + two lane reductions; reuses (x - mu)
    # only once for the normalize step. Means folded to explicit * (1/128).
    inv_n = jnp.float32(1.0 / HIDDEN_DIM)
    mu = jnp.sum(x, axis=-1, keepdims=True) * inv_n
    ex2 = jnp.sum(x * x, axis=-1, keepdims=True) * inv_n
    var = ex2 - mu * mu
    rstd = jax.lax.rsqrt(var + LN_EPS)
    return (x - mu) * rstd * gamma + beta


# ---------------------------- the Pallas kernel --------------------------------
def _mlp_planner_kernel(n_sub, sub_rows,
                        xl_ref, xr_ref,
                        w1a_ref, w1b_ref, vecs_ref,
                        wh_ref, wo_ref, bo_ref,
                        out_ref):
    # Small per-layer {bias, gamma, beta} vectors: load once per invocation.
    vecs = vecs_ref[...]                       # (NUM_LAYERS, 3, HIDDEN_DIM), ~6 KiB

    # Process the batch tile as n_sub independent row sub-chunks so the MXU work
    # of chunk c+1 overlaps the LN/GELU (XLU/VALU/EUP) work of chunk c.
    for c in range(n_sub):
        r0, r1 = c * sub_rows, (c + 1) * sub_rows

        # layer 1: Linear(INPUT_DIM -> HIDDEN_DIM); input normalization already
        # folded into w1a/w1b and the packed bias; left/right halves kept split
        # (no concat in the wrapper).
        h = (jnp.dot(xl_ref[r0:r1, :], w1a_ref[...], preferred_element_type=jnp.float32)
             + jnp.dot(xr_ref[r0:r1, :], w1b_ref[...], preferred_element_type=jnp.float32)
             + vecs[0, 0:1])
        h = _gelu_exact(_layernorm(h, vecs[0, 1:2], vecs[0, 2:3]))

        # hidden layers 2..NUM_LAYERS: Linear + LayerNorm + GELU
        for i in range(NUM_LAYERS - 1):
            h = (jnp.dot(h, wh_ref[i], preferred_element_type=jnp.float32)
                 + vecs[i + 1, 0:1])
            h = _gelu_exact(_layernorm(h, vecs[i + 1, 1:2], vecs[i + 1, 2:3]))

        # output head: Linear(HIDDEN_DIM -> OUT_PAD); columns >= OUTPUT_DIM are zero.
        out_ref[r0:r1, :] = (jnp.dot(h, wo_ref[...], preferred_element_type=jnp.float32)
                             + bo_ref[...])


# ---------------------------- wrapper / glue ------------------------------------
def _cdiv(a, m):
    return (a + m - 1) // m


def _round_up(a, m):
    return _cdiv(a, m) * m


def _choose_tiling(b):
    """Balanced batch split: big tiles, but never >~8*n_sub rows of padding and
    at least 2 tiles once B >= 256 (so v7x megacore has something to shard)."""
    target = 1024
    n_tiles = max(_cdiv(b, target), 1)
    if b >= 256:
        n_tiles = max(n_tiles, 2)
    raw = _cdiv(b, n_tiles)
    if raw >= 512:
        n_sub = 4            # 128+ row sub-chunks inside the kernel
    elif raw >= 256:
        n_sub = 2
    else:
        n_sub = 1
    tile_b = _round_up(raw, 8 * n_sub)
    n_tiles = _cdiv(b, tile_b)
    return tile_b, n_tiles, n_sub


@jax.jit
def mlp_planner_forward(track_left, track_right, params):
    """track_left/right: (B, N_TRACK, 2) float32 -> (B, N_WAYPOINTS, 2) float32."""
    b = track_left.shape[0]
    xl = track_left.reshape(b, HALF_DIM)       # contiguous -> free reshape
    xr = track_right.reshape(b, HALF_DIM)

    # ---- trace-time weight preprocessing ------------------------------------
    # fold per-feature normalization into Linear #1
    m40 = jnp.tile(INPUT_MEAN, INPUT_DIM // 2)             # (40,)
    s40 = jnp.tile(INPUT_STD, INPUT_DIM // 2)              # (40,)
    w1f = params["w1"] / s40[:, None]                       # (40, 128)
    b1f = params["b1"] - (m40 / s40)[None, :] @ params["w1"]    # (1, 128)
    w1a, w1b = w1f[:HALF_DIM], w1f[HALF_DIM:]

    # pack per-layer {bias, gamma, beta} into one (NUM_LAYERS, 3, HIDDEN) operand
    layer0 = jnp.concatenate([b1f, params["g1"], params["bt1"]], axis=0)      # (3, H)
    rest = jnp.concatenate([params["bh"], params["gh"], params["bth"]], axis=1)  # (L-1, 3, H)
    vecs = jnp.concatenate([layer0[None], rest], axis=0)                      # (L, 3, H)

    # zero-pad the output head to a lane-dense 128 columns (unmasked vst; most
    # important on v5e's single store slot — see review note on HBM-write waste).
    wo_p = jnp.pad(params["wo"], ((0, 0), (0, OUT_PAD - OUTPUT_DIM)))
    bo_p = jnp.pad(params["bo"], ((0, 0), (0, OUT_PAD - OUTPUT_DIM)))

    # ---- batch tiling ---------------------------------------------------------
    tile_b, n_tiles, n_sub = _choose_tiling(b)
    sub_rows = tile_b // n_sub
    b_pad = n_tiles * tile_b
    if b_pad != b:
        xl = jnp.pad(xl, ((0, b_pad - b), (0, 0)))
        xr = jnp.pad(xr, ((0, b_pad - b), (0, 0)))

    row_spec = lambda shape: pl.BlockSpec(shape, lambda i: (i, 0))     # batch-tiled
    const2 = lambda shape: pl.BlockSpec(shape, lambda i: (0, 0))       # VMEM-resident
    const3 = lambda shape: pl.BlockSpec(shape, lambda i: (0, 0, 0))

    grid_spec = pltpu.PrefetchScalarGridSpec(
        num_scalar_prefetch=0,
        grid=(n_tiles,),
        in_specs=[
            row_spec((tile_b, HALF_DIM)),                          # xl
            row_spec((tile_b, HALF_DIM)),                          # xr
            const2((HALF_DIM, HIDDEN_DIM)),                        # w1a (folded)
            const2((HALF_DIM, HIDDEN_DIM)),                        # w1b (folded)
            const3((NUM_LAYERS, 3, HIDDEN_DIM)),                   # packed bias/gamma/beta
            const3((NUM_LAYERS - 1, HIDDEN_DIM, HIDDEN_DIM)),      # wh
            const2((HIDDEN_DIM, OUT_PAD)),                         # wo (lane-padded)
            const2((1, OUT_PAD)),                                  # bo (lane-padded)
        ],
        out_specs=pl.BlockSpec((tile_b, OUT_PAD), lambda i: (i, 0)),
    )

    # advisory cost estimate so XLA overlaps this small kernel with neighbors
    flops = 2 * b_pad * (INPUT_DIM * HIDDEN_DIM
                         + (NUM_LAYERS - 1) * HIDDEN_DIM * HIDDEN_DIM
                         + HIDDEN_DIM * OUT_PAD)
    transcendentals = 2 * b_pad * NUM_LAYERS * HIDDEN_DIM
    weight_bytes = 4 * (INPUT_DIM * HIDDEN_DIM
                        + (NUM_LAYERS - 1) * HIDDEN_DIM * HIDDEN_DIM
                        + HIDDEN_DIM * OUT_PAD
                        + NUM_LAYERS * 3 * HIDDEN_DIM + OUT_PAD)
    bytes_accessed = 4 * b_pad * (2 * HALF_DIM + OUT_PAD) + weight_bytes

    out = pl.pallas_call(
        partial(_mlp_planner_kernel, n_sub, sub_rows),
        out_shape=jax.ShapeDtypeStruct((b_pad, OUT_PAD), jnp.float32),
        grid_spec=grid_spec,
        compiler_params=pltpu.CompilerParams(
            dimension_semantics=("parallel",)),   # v7x megacore; no-op on v5e/v6e
        cost_estimate=pl.CostEstimate(flops=flops,
                                      transcendentals=transcendentals,
                                      bytes_accessed=bytes_accessed),
    )(xl, xr, w1a, w1b, vecs, params["wh"], wo_p, bo_p)

    return out[:b, :OUTPUT_DIM].reshape(b, N_WAYPOINTS, 2)


# ---------------------------- parameter init -----------------------------------
def _xavier_uniform(key, fan_in, fan_out):
    a = math.sqrt(6.0 / (fan_in + fan_out))
    # stored as (in, out): kernel computes x @ W  (== torch x @ W.T with W (out,in))
    return jax.random.uniform(key, (fan_in, fan_out), jnp.float32, minval=-a, maxval=a)


def init_params(key):
    keys = jax.random.split(key, NUM_LAYERS + 1)
    w1 = _xavier_uniform(keys[0], INPUT_DIM, HIDDEN_DIM)
    b1 = jnp.zeros((1, HIDDEN_DIM), jnp.float32)
    g1 = jnp.ones((1, HIDDEN_DIM), jnp.float32)
    bt1 = jnp.zeros((1, HIDDEN_DIM), jnp.float32)

    wh = jnp.stack([_xavier_uniform(keys[1 + i], HIDDEN_DIM, HIDDEN_DIM)
                    for i in range(NUM_LAYERS - 1)])                 # (3, 128, 128)
    bh = jnp.zeros((NUM_LAYERS - 1, 1, HIDDEN_DIM), jnp.float32)
    gh = jnp.ones((NUM_LAYERS - 1, 1, HIDDEN_DIM), jnp.float32)
    bth = jnp.zeros((NUM_LAYERS - 1, 1, HIDDEN_DIM), jnp.float32)

    wo = _xavier_uniform(keys[NUM_LAYERS], HIDDEN_DIM, OUTPUT_DIM)
    bo = jnp.zeros((1, OUTPUT_DIM), jnp.float32)
    return dict(w1=w1, b1=b1, g1=g1, bt1=bt1,
                wh=wh, bh=bh, gh=gh, bth=bth,
                wo=wo, bo=bo)


# ---------------------------- pure-JAX reference --------------------------------
def reference_forward(track_left, track_right, params):
    b = track_left.shape[0]
    tl = (track_left - INPUT_MEAN[None, None, :]) / INPUT_STD[None, None, :]
    tr = (track_right - INPUT_MEAN[None, None, :]) / INPUT_STD[None, None, :]
    x = jnp.concatenate([tl.reshape(b, -1), tr.reshape(b, -1)], axis=1)

    def ln(h, g, bt):
        mu = jnp.mean(h, axis=-1, keepdims=True)
        var = jnp.mean((h - mu) ** 2, axis=-1, keepdims=True)
        return (h - mu) / jnp.sqrt(var + LN_EPS) * g + bt

    h = x @ params["w1"] + params["b1"]
    h = jax.nn.gelu(ln(h, params["g1"], params["bt1"]), approximate=False)
    for i in range(NUM_LAYERS - 1):
        h = h @ params["wh"][i] + params["bh"][i]
        h = jax.nn.gelu(ln(h, params["gh"][i], params["bth"][i]), approximate=False)
    out = h @ params["wo"] + params["bo"]
    return out.reshape(b, N_WAYPOINTS, 2)


# ---------------------------------- main ----------------------------------------
if __name__ == "__main__":
    key = jax.random.PRNGKey(0)
    k_params, k_left, k_right = jax.random.split(key, 3)

    params = init_params(k_params)

    ok = True
    # small primary check (single tile, single sub-chunk) + a second check that
    # exercises multi-tile + sub-chunk + row-padding paths (B=520 -> 2x272, 2 sub-chunks)
    for batch in (4, 520):
        kl, kr = jax.random.split(jax.random.fold_in(key, batch))
        track_left = jax.random.normal(kl, (batch, N_TRACK, 2), jnp.float32) * 0.2 + 0.27
        track_right = jax.random.normal(kr, (batch, N_TRACK, 2), jnp.float32) * 0.2 + 0.27

        waypoints = jax.block_until_ready(
            mlp_planner_forward(track_left, track_right, params))
        ref = reference_forward(track_left, track_right, params)

        assert waypoints.shape == (batch, N_WAYPOINTS, 2)
        max_err = jnp.max(jnp.abs(waypoints - ref))
        assert jnp.allclose(waypoints, ref, atol=1e-4, rtol=1e-4), (
            f"batch={batch}: max abs err {max_err}")
        ok = ok and bool(jnp.isfinite(max_err))

    if ok:
        print("KERNEL_OK")
</pallas_src>

<mosaic_0001>
module attributes {stable_mosaic.version = 11 : i64} {
  func.func @_mlp_planner_kernel(%arg0: i32, %arg1: memref<8x20xf32, #tpu.memory_space<vmem>>, %arg2: memref<8x20xf32, #tpu.memory_space<vmem>>, %arg3: memref<20x128xf32, #tpu.memory_space<vmem>>, %arg4: memref<20x128xf32, #tpu.memory_space<vmem>>, %arg5: memref<4x3x128xf32, #tpu.memory_space<vmem>>, %arg6: memref<3x128x128xf32, #tpu.memory_space<vmem>>, %arg7: memref<128x128xf32, #tpu.memory_space<vmem>>, %arg8: memref<1x128xf32, #tpu.memory_space<vmem>>, %arg9: memref<8x128xf32, #tpu.memory_space<vmem>>) attributes {dimension_semantics = [#tpu.dimension_semantics<parallel>], iteration_bounds = array<i64: 1>, scalar_prefetch = 0 : i64, scratch_operands = 0 : i64, tpu.core_type = #tpu.core_type<tc>, window_params = [{transform_indices = @transform_0, window_bounds = array<i64: 8, 20>}, {transform_indices = @transform_1, window_bounds = array<i64: 8, 20>}, {pipeline_mode = #tpu.pipeline_mode<synchronous>, transform_indices = @transform_2, window_bounds = array<i64: 20, 128>}, {pipeline_mode = #tpu.pipeline_mode<synchronous>, transform_indices = @transform_3, window_bounds = array<i64: 20, 128>}, {pipeline_mode = #tpu.pipeline_mode<synchronous>, transform_indices = @transform_4, window_bounds = array<i64: 4, 3, 128>}, {pipeline_mode = #tpu.pipeline_mode<synchronous>, transform_indices = @transform_5, window_bounds = array<i64: 3, 128, 128>}, {pipeline_mode = #tpu.pipeline_mode<synchronous>, transform_indices = @transform_6, window_bounds = array<i64: 128, 128>}, {pipeline_mode = #tpu.pipeline_mode<synchronous>, transform_indices = @transform_7, window_bounds = array<i64: 1, 128>}, {transform_indices = @transform_8, window_bounds = array<i64: 8, 128>}]} {
    %c0 = arith.constant 0 : index
    %c0_0 = arith.constant 0 : index
    %c0_1 = arith.constant 0 : index
    %0 = vector.load %arg5[%c0, %c0_0, %c0_1] : memref<4x3x128xf32, #tpu.memory_space<vmem>>, vector<4x3x128xf32>
    %c0_2 = arith.constant 0 : index
    %c0_3 = arith.constant 0 : index
    %1 = vector.load %arg1[%c0_2, %c0_3] : memref<8x20xf32, #tpu.memory_space<vmem>>, vector<8x20xf32>
    %c0_4 = arith.constant 0 : index
    %c0_5 = arith.constant 0 : index
    %2 = vector.load %arg3[%c0_4, %c0_5] : memref<20x128xf32, #tpu.memory_space<vmem>>, vector<20x128xf32>
    %cst = arith.constant dense<0.000000e+00> : vector<8x128xf32>
    %3 = tpu.matmul %1, %2, %cst {dimension_numbers = #tpu.dot_dimension_numbers<[1], [0], [0], [1], [0, 0, 1, 1], [], []>} : vector<8x20xf32>, vector<20x128xf32>, vector<8x128xf32> -> vector<8x128xf32>
    %c0_6 = arith.constant 0 : index
    %c0_7 = arith.constant 0 : index
    %4 = vector.load %arg2[%c0_6, %c0_7] : memref<8x20xf32, #tpu.memory_space<vmem>>, vector<8x20xf32>
    %c0_8 = arith.constant 0 : index
    %c0_9 = arith.constant 0 : index
    %5 = vector.load %arg4[%c0_8, %c0_9] : memref<20x128xf32, #tpu.memory_space<vmem>>, vector<20x128xf32>
    %cst_10 = arith.constant dense<0.000000e+00> : vector<8x128xf32>
    %6 = tpu.matmul %4, %5, %cst_10 {dimension_numbers = #tpu.dot_dimension_numbers<[1], [0], [0], [1], [0, 0, 1, 1], [], []>} : vector<8x20xf32>, vector<20x128xf32>, vector<8x128xf32> -> vector<8x128xf32>
    %7 = arith.addf %3, %6 : vector<8x128xf32>
    %8 = vector.extract_strided_slice %0 {offsets = [0, 0, 0], sizes = [1, 1, 128], strides = [1, 1, 1]} : vector<4x3x128xf32> to vector<1x1x128xf32>
    %9 = vector.shape_cast %8 : vector<1x1x128xf32> to vector<1x128xf32>
    %10 = vector.broadcast %9 : vector<1x128xf32> to vector<8x128xf32>
    %11 = arith.addf %7, %10 : vector<8x128xf32>
    %12 = vector.extract_strided_slice %0 {offsets = [0, 1, 0], sizes = [1, 1, 128], strides = [1, 1, 1]} : vector<4x3x128xf32> to vector<1x1x128xf32>
    %13 = vector.shape_cast %12 : vector<1x1x128xf32> to vector<1x128xf32>
    %14 = vector.extract_strided_slice %0 {offsets = [0, 2, 0], sizes = [1, 1, 128], strides = [1, 1, 1]} : vector<4x3x128xf32> to vector<1x1x128xf32>
    %15 = vector.shape_cast %14 : vector<1x1x128xf32> to vector<1x128xf32>
    %cst_11 = arith.constant dense<0.000000e+00> : vector<8xf32>
    %16 = vector.multi_reduction <add>, %11, %cst_11 [1] : vector<8x128xf32> to vector<8xf32>
    %17 = vector.shape_cast %16 : vector<8xf32> to vector<8x1xf32>
    %cst_12 = arith.constant 7.812500e-03 : f32
    %18 = vector.broadcast %cst_12 : f32 to vector<8x1xf32>
    %19 = arith.mulf %17, %18 : vector<8x1xf32>
    %20 = arith.mulf %11, %11 : vector<8x128xf32>
    %cst_13 = arith.constant dense<0.000000e+00> : vector<8xf32>
    %21 = vector.multi_reduction <add>, %20, %cst_13 [1] : vector<8x128xf32> to vector<8xf32>
    %22 = vector.shape_cast %21 : vector<8xf32> to vector<8x1xf32>
    %cst_14 = arith.constant 7.812500e-03 : f32
    %23 = vector.broadcast %cst_14 : f32 to vector<8x1xf32>
    %24 = arith.mulf %22, %23 : vector<8x1xf32>
    %25 = arith.mulf %19, %19 : vector<8x1xf32>
    %26 = arith.subf %24, %25 : vector<8x1xf32>
    %cst_15 = arith.constant 9.99999974E-6 : f32
    %27 = vector.broadcast %cst_15 : f32 to vector<8x1xf32>
    %28 = arith.addf %26, %27 : vector<8x1xf32>
    %29 = math.rsqrt %28 : vector<8x1xf32>
    %30 = vector.broadcast %19 : vector<8x1xf32> to vector<8x128xf32>
    %31 = arith.subf %11, %30 : vector<8x128xf32>
    %32 = vector.broadcast %29 : vector<8x1xf32> to vector<8x128xf32>
    %33 = arith.mulf %31, %32 : vector<8x128xf32>
    %34 = vector.broadcast %13 : vector<1x128xf32> to vector<8x128xf32>
    %35 = arith.mulf %33, %34 : vector<8x128xf32>
    %36 = vector.broadcast %15 : vector<1x128xf32> to vector<8x128xf32>
    %37 = arith.addf %35, %36 : vector<8x128xf32>
    %cst_16 = arith.constant 5.000000e-01 : f32
    %38 = vector.broadcast %cst_16 : f32 to vector<8x128xf32>
    %39 = arith.mulf %38, %37 : vector<8x128xf32>
    %cst_17 = arith.constant 0.707106769 : f32
    %40 = vector.broadcast %cst_17 : f32 to vector<8x128xf32>
    %41 = arith.mulf %37, %40 : vector<8x128xf32>
    %42 = math.absf %41 : vector<8x128xf32>
    %cst_18 = arith.constant 0.327591091 : f32
    %43 = vector.broadcast %cst_18 : f32 to vector<8x128xf32>
    %44 = arith.mulf %43, %42 : vector<8x128xf32>
    %cst_19 = arith.constant 1.000000e+00 : f32
    %45 = vector.broadcast %cst_19 : f32 to vector<8x128xf32>
    %46 = arith.addf %45, %44 : vector<8x128xf32>
    %47 = tpu.reciprocal %46 {approx = true} : vector<8x128xf32> -> vector<8x128xf32>
    %48 = arith.mulf %46, %47 : vector<8x128xf32>
    %cst_20 = arith.constant 2.000000e+00 : f32
    %49 = vector.broadcast %cst_20 : f32 to vector<8x128xf32>
    %50 = arith.subf %49, %48 : vector<8x128xf32>
    %51 = arith.mulf %47, %50 : vector<8x128xf32>
    %cst_21 = arith.constant 1.06140542 : f32
    %52 = vector.broadcast %cst_21 : f32 to vector<8x128xf32>
    %53 = arith.mulf %52, %51 : vector<8x128xf32>
    %cst_22 = arith.constant -1.45315206 : f32
    %54 = vector.broadcast %cst_22 : f32 to vector<8x128xf32>
    %55 = arith.addf %53, %54 : vector<8x128xf32>
    %56 = arith.mulf %55, %51 : vector<8x128xf32>
    %cst_23 = arith.constant 1.42141378 : f32
    %57 = vector.broadcast %cst_23 : f32 to vector<8x128xf32>
    %58 = arith.addf %56, %57 : vector<8x128xf32>
    %59 = arith.mulf %58, %51 : vector<8x128xf32>
    %cst_24 = arith.constant -0.284496725 : f32
    %60 = vector.broadcast %cst_24 : f32 to vector<8x128xf32>
    %61 = arith.addf %59, %60 : vector<8x128xf32>
    %62 = arith.mulf %61, %51 : vector<8x128xf32>
    %cst_25 = arith.constant 0.254829586 : f32
    %63 = vector.broadcast %cst_25 : f32 to vector<8x128xf32>
    %64 = arith.addf %62, %63 : vector<8x128xf32>
    %65 = arith.mulf %64, %51 : vector<8x128xf32>
    %cst_26 = arith.constant 0.000000e+00 : f32
    %66 = vector.broadcast %cst_26 : f32 to vector<8x128xf32>
    %67 = arith.subf %66, %42 : vector<8x128xf32>
    %68 = arith.mulf %67, %42 : vector<8x128xf32>
    %69 = math.exp %68 : vector<8x128xf32>
    %70 = arith.mulf %65, %69 : vector<8x128xf32>
    %cst_27 = arith.constant 1.000000e+00 : f32
    %71 = vector.broadcast %cst_27 : f32 to vector<8x128xf32>
    %72 = arith.subf %71, %70 : vector<8x128xf32>
    %cst_28 = arith.constant 0.000000e+00 : f32
    %73 = vector.broadcast %cst_28 : f32 to vector<8x128xf32>
    %74 = arith.cmpf oge, %41, %73 : vector<8x128xf32>
    %cst_29 = arith.constant 0.000000e+00 : f32
    %75 = vector.broadcast %cst_29 : f32 to vector<8x128xf32>
    %76 = arith.subf %75, %72 : vector<8x128xf32>
    %77 = arith.select %74, %72, %76 : vector<8x128xi1>, vector<8x128xf32>
    %cst_30 = arith.constant 1.000000e+00 : f32
    %78 = vector.broadcast %cst_30 : f32 to vector<8x128xf32>
    %79 = arith.addf %78, %77 : vector<8x128xf32>
    %80 = arith.mulf %39, %79 : vector<8x128xf32>
    %c0_31 = arith.constant 0 : index
    %c0_32 = arith.constant 0 : index
    %c0_33 = arith.constant 0 : index
    %81 = vector.load %arg6[%c0_31, %c0_32, %c0_33] : memref<3x128x128xf32, #tpu.memory_space<vmem>>, vector<1x128x128xf32>
    %82 = vector.shape_cast %81 : vector<1x128x128xf32> to vector<128x128xf32>
    %cst_34 = arith.constant dense<0.000000e+00> : vector<8x128xf32>
    %83 = tpu.matmul %80, %82, %cst_34 {dimension_numbers = #tpu.dot_dimension_numbers<[1], [0], [0], [1], [0, 0, 1, 1], [], []>} : vector<8x128xf32>, vector<128x128xf32>, vector<8x128xf32> -> vector<8x128xf32>
    %84 = vector.extract_strided_slice %0 {offsets = [1, 0, 0], sizes = [1, 1, 128], strides = [1, 1, 1]} : vector<4x3x128xf32> to vector<1x1x128xf32>
    %85 = vector.shape_cast %84 : vector<1x1x128xf32> to vector<1x128xf32>
    %86 = vector.broadcast %85 : vector<1x128xf32> to vector<8x128xf32>
    %87 = arith.addf %83, %86 : vector<8x128xf32>
    %88 = vector.extract_strided_slice %0 {offsets = [1, 1, 0], sizes = [1, 1, 128], strides = [1, 1, 1]} : vector<4x3x128xf32> to vector<1x1x128xf32>
    %89 = vector.shape_cast %88 : vector<1x1x128xf32> to vector<1x128xf32>
    %90 = vector.extract_strided_slice %0 {offsets = [1, 2, 0], sizes = [1, 1, 128], strides = [1, 1, 1]} : vector<4x3x128xf32> to vector<1x1x128xf32>
    %91 = vector.shape_cast %90 : vector<1x1x128xf32> to vector<1x128xf32>
    %cst_35 = arith.constant dense<0.000000e+00> : vector<8xf32>
    %92 = vector.multi_reduction <add>, %87, %cst_35 [1] : vector<8x128xf32> to vector<8xf32>
    %93 = vector.shape_cast %92 : vector<8xf32> to vector<8x1xf32>
    %cst_36 = arith.constant 7.812500e-03 : f32
    %94 = vector.broadcast %cst_36 : f32 to vector<8x1xf32>
    %95 = arith.mulf %93, %94 : vector<8x1xf32>
    %96 = arith.mulf %87, %87 : vector<8x128xf32>
    %cst_37 = arith.constant dense<0.000000e+00> : vector<8xf32>
    %97 = vector.multi_reduction <add>, %96, %cst_37 [1] : vector<8x128xf32> to vector<8xf32>
    %98 = vector.shape_cast %97 : vector<8xf32> to vector<8x1xf32>
    %cst_38 = arith.constant 7.812500e-03 : f32
    %99 = vector.broadcast %cst_38 : f32 to vector<8x1xf32>
    %100 = arith.mulf %98, %99 : vector<8x1xf32>
    %101 = arith.mulf %95, %95 : vector<8x1xf32>
    %102 = arith.subf %100, %101 : vector<8x1xf32>
    %cst_39 = arith.constant 9.99999974E-6 : f32
    %103 = vector.broadcast %cst_39 : f32 to vector<8x1xf32>
    %104 = arith.addf %102, %103 : vector<8x1xf32>
    %105 = math.rsqrt %104 : vector<8x1xf32>
    %106 = vector.broadcast %95 : vector<8x1xf32> to vector<8x128xf32>
    %107 = arith.subf %87, %106 : vector<8x128xf32>
    %108 = vector.broadcast %105 : vector<8x1xf32> to vector<8x128xf32>
    %109 = arith.mulf %107, %108 : vector<8x128xf32>
    %110 = vector.broadcast %89 : vector<1x128xf32> to vector<8x128xf32>
    %111 = arith.mulf %109, %110 : vector<8x128xf32>
    %112 = vector.broadcast %91 : vector<1x128xf32> to vector<8x128xf32>
    %113 = arith.addf %111, %112 : vector<8x128xf32>
    %cst_40 = arith.constant 5.000000e-01 : f32
    %114 = vector.broadcast %cst_40 : f32 to vector<8x128xf32>
    %115 = arith.mulf %114, %113 : vector<8x128xf32>
    %cst_41 = arith.constant 0.707106769 : f32
    %116 = vector.broadcast %cst_41 : f32 to vector<8x128xf32>
    %117 = arith.mulf %113, %116 : vector<8x128xf32>
    %118 = math.absf %117 : vector<8x128xf32>
    %cst_42 = arith.constant 0.327591091 : f32
    %119 = vector.broadcast %cst_42 : f32 to vector<8x128xf32>
    %120 = arith.mulf %119, %118 : vector<8x128xf32>
    %cst_43 = arith.constant 1.000000e+00 : f32
    %121 = vector.broadcast %cst_43 : f32 to vector<8x128xf32>
    %122 = arith.addf %121, %120 : vector<8x128xf32>
    %123 = tpu.reciprocal %122 {approx = true} : vector<8x128xf32> -> vector<8x128xf32>
    %124 = arith.mulf %122, %123 : vector<8x128xf32>
    %cst_44 = arith.constant 2.000000e+00 : f32
    %125 = vector.broadcast %cst_44 : f32 to vector<8x128xf32>
    %126 = arith.subf %125, %124 : vector<8x128xf32>
    %127 = arith.mulf %123, %126 : vector<8x128xf32>
    %cst_45 = arith.constant 1.06140542 : f32
    %128 = vector.broadcast %cst_45 : f32 to vector<8x128xf32>
    %129 = arith.mulf %128, %127 : vector<8x128xf32>
    %cst_46 = arith.constant -1.45315206 : f32
    %130 = vector.broadcast %cst_46 : f32 to vector<8x128xf32>
    %131 = arith.addf %129, %130 : vector<8x128xf32>
    %132 = arith.mulf %131, %127 : vector<8x128xf32>
    %cst_47 = arith.constant 1.42141378 : f32
    %133 = vector.broadcast %cst_47 : f32 to vector<8x128xf32>
    %134 = arith.addf %132, %133 : vector<8x128xf32>
    %135 = arith.mulf %134, %127 : vector<8x128xf32>
    %cst_48 = arith.constant -0.284496725 : f32
    %136 = vector.broadcast %cst_48 : f32 to vector<8x128xf32>
    %137 = arith.addf %135, %136 : vector<8x128xf32>
    %138 = arith.mulf %137, %127 : vector<8x128xf32>
    %cst_49 = arith.constant 0.254829586 : f32
    %139 = vector.broadcast %cst_49 : f32 to vector<8x128xf32>
    %140 = arith.addf %138, %139 : vector<8x128xf32>
    %141 = arith.mulf %140, %127 : vector<8x128xf32>
    %cst_50 = arith.constant 0.000000e+00 : f32
    %142 = vector.broadcast %cst_50 : f32 to vector<8x128xf32>
    %143 = arith.subf %142, %118 : vector<8x128xf32>
    %144 = arith.mulf %143, %118 : vector<8x128xf32>
    %145 = math.exp %144 : vector<8x128xf32>
    %146 = arith.mulf %141, %145 : vector<8x128xf32>
    %cst_51 = arith.constant 1.000000e+00 : f32
    %147 = vector.broadcast %cst_51 : f32 to vector<8x128xf32>
    %148 = arith.subf %147, %146 : vector<8x128xf32>
    %cst_52 = arith.constant 0.000000e+00 : f32
    %149 = vector.broadcast %cst_52 : f32 to vector<8x128xf32>
    %150 = arith.cmpf oge, %117, %149 : vector<8x128xf32>
    %cst_53 = arith.constant 0.000000e+00 : f32
    %151 = vector.broadcast %cst_53 : f32 to vector<8x128xf32>
    %152 = arith.subf %151, %148 : vector<8x128xf32>
    %153 = arith.select %150, %148, %152 : vector<8x128xi1>, vector<8x128xf32>
    %cst_54 = arith.constant 1.000000e+00 : f32
    %154 = vector.broadcast %cst_54 : f32 to vector<8x128xf32>
    %155 = arith.addf %154, %153 : vector<8x128xf32>
    %156 = arith.mulf %115, %155 : vector<8x128xf32>
    %c1 = arith.constant 1 : index
    %c0_55 = arith.constant 0 : index
    %c0_56 = arith.constant 0 : index
    %157 = vector.load %arg6[%c1, %c0_55, %c0_56] : memref<3x128x128xf32, #tpu.memory_space<vmem>>, vector<1x128x128xf32>
    %158 = vector.shape_cast %157 : vector<1x128x128xf32> to vector<128x128xf32>
    %cst_57 = arith.constant dense<0.000000e+00> : vector<8x128xf32>
    %159 = tpu.matmul %156, %158, %cst_57 {dimension_numbers = #tpu.dot_dimension_numbers<[1], [0], [0], [1], [0, 0, 1, 1], [], []>} : vector<8x128xf32>, vector<128x128xf32>, vector<8x128xf32> -> vector<8x128xf32>
    %160 = vector.extract_strided_slice %0 {offsets = [2, 0, 0], sizes = [1, 1, 128], strides = [1, 1, 1]} : vector<4x3x128xf32> to vector<1x1x128xf32>
    %161 = vector.shape_cast %160 : vector<1x1x128xf32> to vector<1x128xf32>
    %162 = vector.broadcast %161 : vector<1x128xf32> to vector<8x128xf32>
    %163 = arith.addf %159, %162 : vector<8x128xf32>
    %164 = vector.extract_strided_slice %0 {offsets = [2, 1, 0], sizes = [1, 1, 128], strides = [1, 1, 1]} : vector<4x3x128xf32> to vector<1x1x128xf32>
    %165 = vector.shape_cast %164 : vector<1x1x128xf32> to vector<1x128xf32>
    %166 = vector.extract_strided_slice %0 {offsets = [2, 2, 0], sizes = [1, 1, 128], strides = [1, 1, 1]} : vector<4x3x128xf32> to vector<1x1x128xf32>
    %167 = vector.shape_cast %166 : vector<1x1x128xf32> to vector<1x128xf32>
    %cst_58 = arith.constant dense<0.000000e+00> : vector<8xf32>
    %168 = vector.multi_reduction <add>, %163, %cst_58 [1] : vector<8x128xf32> to vector<8xf32>
    %169 = vector.shape_cast %168 : vector<8xf32> to vector<8x1xf32>
    %cst_59 = arith.constant 7.812500e-03 : f32
    %170 = vector.broadcast %cst_59 : f32 to vector<8x1xf32>
    %171 = arith.mulf %169, %170 : vector<8x1xf32>
    %172 = arith.mulf %163, %163 : vector<8x128xf32>
    %cst_60 = arith.constant dense<0.000000e+00> : vector<8xf32>
    %173 = vector.multi_reduction <add>, %172, %cst_60 [1] : vector<8x128xf32> to vector<8xf32>
    %174 = vector.shape_cast %173 : vector<8xf32> to vector<8x1xf32>
    %cst_61 = arith.constant 7.812500e-03 : f32
    %175 = vector.broadcast %cst_61 : f32 to vector<8x1xf32>
    %176 = arith.mulf %174, %175 : vector<8x1xf32>
    %177 = arith.mulf %171, %171 : vector<8x1xf32>
    %178 = arith.subf %176, %177 : vector<8x1xf32>
    %cst_62 = arith.constant 9.99999974E-6 : f32
    %179 = vector.broadcast %cst_62 : f32 to vector<8x1xf32>
    %180 = arith.addf %178, %179 : vector<8x1xf32>
    %181 = math.rsqrt %180 : vector<8x1xf32>
    %182 = vector.broadcast %171 : vector<8x1xf32> to vector<8x128xf32>
    %183 = arith.subf %163, %182 : vector<8x128xf32>
    %184 = vector.broadcast %181 : vector<8x1xf32> to vector<8x128xf32>
    %185 = arith.mulf %183, %184 : vector<8x128xf32>
    %186 = vector.broadcast %165 : vector<1x128xf32> to vector<8x128xf32>
    %187 = arith.mulf %185, %186 : vector<8x128xf32>
    %188 = vector.broadcast %167 : vector<1x128xf32> to vector<8x128xf32>
    %189 = arith.addf %187, %188 : vector<8x128xf32>
    %cst_63 = arith.constant 5.000000e-01 : f32
    %190 = vector.broadcast %cst_63 : f32 to vector<8x128xf32>
    %191 = arith.mulf %190, %189 : vector<8x128xf32>
    %cst_64 = arith.constant 0.707106769 : f32
    %192 = vector.broadcast %cst_64 : f32 to vector<8x128xf32>
    %193 = arith.mulf %189, %192 : vector<8x128xf32>
    %194 = math.absf %193 : vector<8x128xf32>
    %cst_65 = arith.constant 0.327591091 : f32
    %195 = vector.broadcast %cst_65 : f32 to vector<8x128xf32>
    %196 = arith.mulf %195, %194 : vector<8x128xf32>
    %cst_66 = arith.constant 1.000000e+00 : f32
    %197 = vector.broadcast %cst_66 : f32 to vector<8x128xf32>
    %198 = arith.addf %197, %196 : vector<8x128xf32>
    %199 = tpu.reciprocal %198 {approx = true} : vector<8x128xf32> -> vector<8x128xf32>
    %200 = arith.mulf %198, %199 : vector<8x128xf32>
    %cst_67 = arith.constant 2.000000e+00 : f32
    %201 = vector.broadcast %cst_67 : f32 to vector<8x128xf32>
    %202 = arith.subf %201, %200 : vector<8x128xf32>
    %203 = arith.mulf %199, %202 : vector<8x128xf32>
    %cst_68 = arith.constant 1.06140542 : f32
    %204 = vector.broadcast %cst_68 : f32 to vector<8x128xf32>
    %205 = arith.mulf %204, %203 : vector<8x128xf32>
    %cst_69 = arith.constant -1.45315206 : f32
    %206 = vector.broadcast %cst_69 : f32 to vector<8x128xf32>
    %207 = arith.addf %205, %206 : vector<8x128xf32>
    %208 = arith.mulf %207, %203 : vector<8x128xf32>
    %cst_70 = arith.constant 1.42141378 : f32
    %209 = vector.broadcast %cst_70 : f32 to vector<8x128xf32>
    %210 = arith.addf %208, %209 : vector<8x128xf32>
    %211 = arith.mulf %210, %203 : vector<8x128xf32>
    %cst_71 = arith.constant -0.284496725 : f32
    %212 = vector.broadcast %cst_71 : f32 to vector<8x128xf32>
    %213 = arith.addf %211, %212 : vector<8x128xf32>
    %214 = arith.mulf %213, %203 : vector<8x128xf32>
    %cst_72 = arith.constant 0.254829586 : f32
    %215 = vector.broadcast %cst_72 : f32 to vector<8x128xf32>
    %216 = arith.addf %214, %215 : vector<8x128xf32>
    %217 = arith.mulf %216, %203 : vector<8x128xf32>
    %cst_73 = arith.constant 0.000000e+00 : f32
    %218 = vector.broadcast %cst_73 : f32 to vector<8x128xf32>
    %219 = arith.subf %218, %194 : vector<8x128xf32>
    %220 = arith.mulf %219, %194 : vector<8x128xf32>
    %221 = math.exp %220 : vector<8x128xf32>
    %222 = arith.mulf %217, %221 : vector<8x128xf32>
    %cst_74 = arith.constant 1.000000e+00 : f32
    %223 = vector.broadcast %cst_74 : f32 to vector<8x128xf32>
    %224 = arith.subf %223, %222 : vector<8x128xf32>
    %cst_75 = arith.constant 0.000000e+00 : f32
    %225 = vector.broadcast %cst_75 : f32 to vector<8x128xf32>
    %226 = arith.cmpf oge, %193, %225 : vector<8x128xf32>
    %cst_76 = arith.constant 0.000000e+00 : f32
    %227 = vector.broadcast %cst_76 : f32 to vector<8x128xf32>
    %228 = arith.subf %227, %224 : vector<8x128xf32>
    %229 = arith.select %226, %224, %228 : vector<8x128xi1>, vector<8x128xf32>
    %cst_77 = arith.constant 1.000000e+00 : f32
    %230 = vector.broadcast %cst_77 : f32 to vector<8x128xf32>
    %231 = arith.addf %230, %229 : vector<8x128xf32>
    %232 = arith.mulf %191, %231 : vector<8x128xf32>
    %c2 = arith.constant 2 : index
    %c0_78 = arith.constant 0 : index
    %c0_79 = arith.constant 0 : index
    %233 = vector.load %arg6[%c2, %c0_78, %c0_79] : memref<3x128x128xf32, #tpu.memory_space<vmem>>, vector<1x128x128xf32>
    %234 = vector.shape_cast %233 : vector<1x128x128xf32> to vector<128x128xf32>
    %cst_80 = arith.constant dense<0.000000e+00> : vector<8x128xf32>
    %235 = tpu.matmul %232, %234, %cst_80 {dimension_numbers = #tpu.dot_dimension_numbers<[1], [0], [0], [1], [0, 0, 1, 1], [], []>} : vector<8x128xf32>, vector<128x128xf32>, vector<8x128xf32> -> vector<8x128xf32>
    %236 = vector.extract_strided_slice %0 {offsets = [3, 0, 0], sizes = [1, 1, 128], strides = [1, 1, 1]} : vector<4x3x128xf32> to vector<1x1x128xf32>
    %237 = vector.shape_cast %236 : vector<1x1x128xf32> to vector<1x128xf32>
    %238 = vector.broadcast %237 : vector<1x128xf32> to vector<8x128xf32>
    %239 = arith.addf %235, %238 : vector<8x128xf32>
    %240 = vector.extract_strided_slice %0 {offsets = [3, 1, 0], sizes = [1, 1, 128], strides = [1, 1, 1]} : vector<4x3x128xf32> to vector<1x1x128xf32>
    %241 = vector.shape_cast %240 : vector<1x1x128xf32> to vector<1x128xf32>
    %242 = vector.extract_strided_slice %0 {offsets = [3, 2, 0], sizes = [1, 1, 128], strides = [1, 1, 1]} : vector<4x3x128xf32> to vector<1x1x128xf32>
    %243 = vector.shape_cast %242 : vector<1x1x128xf32> to vector<1x128xf32>
    %cst_81 = arith.constant dense<0.000000e+00> : vector<8xf32>
    %244 = vector.multi_reduction <add>, %239, %cst_81 [1] : vector<8x128xf32> to vector<8xf32>
    %245 = vector.shape_cast %244 : vector<8xf32> to vector<8x1xf32>
    %cst_82 = arith.constant 7.812500e-03 : f32
    %246 = vector.broadcast %cst_82 : f32 to vector<8x1xf32>
    %247 = arith.mulf %245, %246 : vector<8x1xf32>
    %248 = arith.mulf %239, %239 : vector<8x128xf32>
    %cst_83 = arith.constant dense<0.000000e+00> : vector<8xf32>
    %249 = vector.multi_reduction <add>, %248, %cst_83 [1] : vector<8x128xf32> to vector<8xf32>
    %250 = vector.shape_cast %249 : vector<8xf32> to vector<8x1xf32>
    %cst_84 = arith.constant 7.812500e-03 : f32
    %251 = vector.broadcast %cst_84 : f32 to vector<8x1xf32>
    %252 = arith.mulf %250, %251 : vector<8x1xf32>
    %253 = arith.mulf %247, %247 : vector<8x1xf32>
    %254 = arith.subf %252, %253 : vector<8x1xf32>
    %cst_85 = arith.constant 9.99999974E-6 : f32
    %255 = vector.broadcast %cst_85 : f32 to vector<8x1xf32>
    %256 = arith.addf %254, %255 : vector<8x1xf32>
    %257 = math.rsqrt %256 : vector<8x1xf32>
    %258 = vector.broadcast %247 : vector<8x1xf32> to vector<8x128xf32>
    %259 = arith.subf %239, %258 : vector<8x128xf32>
    %260 = vector.broadcast %257 : vector<8x1xf32> to vector<8x128xf32>
    %261 = arith.mulf %259, %260 : vector<8x128xf32>
    %262 = vector.broadcast %241 : vector<1x128xf32> to vector<8x128xf32>
    %263 = arith.mulf %261, %262 : vector<8x128xf32>
    %264 = vector.broadcast %243 : vector<1x128xf32> to vector<8x128xf32>
    %265 = arith.addf %263, %264 : vector<8x128xf32>
    %cst_86 = arith.constant 5.000000e-01 : f32
    %266 = vector.broadcast %cst_86 : f32 to vector<8x128xf32>
    %267 = arith.mulf %266, %265 : vector<8x128xf32>
    %cst_87 = arith.constant 0.707106769 : f32
    %268 = vector.broadcast %cst_87 : f32 to vector<8x128xf32>
    %269 = arith.mulf %265, %268 : vector<8x128xf32>
    %270 = math.absf %269 : vector<8x128xf32>
    %cst_88 = arith.constant 0.327591091 : f32
    %271 = vector.broadcast %cst_88 : f32 to vector<8x128xf32>
    %272 = arith.mulf %271, %270 : vector<8x128xf32>
    %cst_89 = arith.constant 1.000000e+00 : f32
    %273 = vector.broadcast %cst_89 : f32 to vector<8x128xf32>
    %274 = arith.addf %273, %272 : vector<8x128xf32>
    %275 = tpu.reciprocal %274 {approx = true} : vector<8x128xf32> -> vector<8x128xf32>
    %276 = arith.mulf %274, %275 : vector<8x128xf32>
    %cst_90 = arith.constant 2.000000e+00 : f32
    %277 = vector.broadcast %cst_90 : f32 to vector<8x128xf32>
    %278 = arith.subf %277, %276 : vector<8x128xf32>
    %279 = arith.mulf %275, %278 : vector<8x128xf32>
    %cst_91 = arith.constant 1.06140542 : f32
    %280 = vector.broadcast %cst_91 : f32 to vector<8x128xf32>
    %281 = arith.mulf %280, %279 : vector<8x128xf32>
    %cst_92 = arith.constant -1.45315206 : f32
    %282 = vector.broadcast %cst_92 : f32 to vector<8x128xf32>
    %283 = arith.addf %281, %282 : vector<8x128xf32>
    %284 = arith.mulf %283, %279 : vector<8x128xf32>
    %cst_93 = arith.constant 1.42141378 : f32
    %285 = vector.broadcast %cst_93 : f32 to vector<8x128xf32>
    %286 = arith.addf %284, %285 : vector<8x128xf32>
    %287 = arith.mulf %286, %279 : vector<8x128xf32>
    %cst_94 = arith.constant -0.284496725 : f32
    %288 = vector.broadcast %cst_94 : f32 to vector<8x128xf32>
    %289 = arith.addf %287, %288 : vector<8x128xf32>
    %290 = arith.mulf %289, %279 : vector<8x128xf32>
    %cst_95 = arith.constant 0.254829586 : f32
    %291 = vector.broadcast %cst_95 : f32 to vector<8x128xf32>
    %292 = arith.addf %290, %291 : vector<8x128xf32>
    %293 = arith.mulf %292, %279 : vector<8x128xf32>
    %cst_96 = arith.constant 0.000000e+00 : f32
    %294 = vector.broadcast %cst_96 : f32 to vector<8x128xf32>
    %295 = arith.subf %294, %270 : vector<8x128xf32>
    %296 = arith.mulf %295, %270 : vector<8x128xf32>
    %297 = math.exp %296 : vector<8x128xf32>
    %298 = arith.mulf %293, %297 : vector<8x128xf32>
    %cst_97 = arith.constant 1.000000e+00 : f32
    %299 = vector.broadcast %cst_97 : f32 to vector<8x128xf32>
    %300 = arith.subf %299, %298 : vector<8x128xf32>
    %cst_98 = arith.constant 0.000000e+00 : f32
    %301 = vector.broadcast %cst_98 : f32 to vector<8x128xf32>
    %302 = arith.cmpf oge, %269, %301 : vector<8x128xf32>
    %cst_99 = arith.constant 0.000000e+00 : f32
    %303 = vector.broadcast %cst_99 : f32 to vector<8x128xf32>
    %304 = arith.subf %303, %300 : vector<8x128xf32>
    %305 = arith.select %302, %300, %304 : vector<8x128xi1>, vector<8x128xf32>
    %cst_100 = arith.constant 1.000000e+00 : f32
    %306 = vector.broadcast %cst_100 : f32 to vector<8x128xf32>
    %307 = arith.addf %306, %305 : vector<8x128xf32>
    %308 = arith.mulf %267, %307 : vector<8x128xf32>
    %c0_101 = arith.constant 0 : index
    %c0_102 = arith.constant 0 : index
    %309 = vector.load %arg7[%c0_101, %c0_102] : memref<128x128xf32, #tpu.memory_space<vmem>>, vector<128x128xf32>
    %cst_103 = arith.constant dense<0.000000e+00> : vector<8x128xf32>
    %310 = tpu.matmul %308, %309, %cst_103 {dimension_numbers = #tpu.dot_dimension_numbers<[1], [0], [0], [1], [0, 0, 1, 1], [], []>} : vector<8x128xf32>, vector<128x128xf32>, vector<8x128xf32> -> vector<8x128xf32>
    %c0_104 = arith.constant 0 : index
    %c0_105 = arith.constant 0 : index
    %311 = vector.load %arg8[%c0_104, %c0_105] : memref<1x128xf32, #tpu.memory_space<vmem>>, vector<1x128xf32>
    %312 = vector.broadcast %311 : vector<1x128xf32> to vector<8x128xf32>
    %313 = arith.addf %310, %312 : vector<8x128xf32>
    %c0_106 = arith.constant 0 : index
    %c0_107 = arith.constant 0 : index
    %314 = vector.load %arg9[%c0_106, %c0_107] : memref<8x128xf32, #tpu.memory_space<vmem>>, vector<8x128xf32>
    tpu.vector_store %arg9[%c0_106, %c0_107], %313 {strides = array<i32>} : memref<8x128xf32, #tpu.memory_space<vmem>>, vector<8x128xf32>,
    return
  }
  func.func @transform_0(%arg0: i32) -> (i32, i32) {
    %c0_i32 = arith.constant 0 : i32
    %c0_i32_0 = arith.constant 0 : i32
    return %arg0, %c0_i32 : i32, i32
  }
  func.func @transform_1(%arg0: i32) -> (i32, i32) {
    %c0_i32 = arith.constant 0 : i32
    %c0_i32_0 = arith.constant 0 : i32
    return %arg0, %c0_i32 : i32, i32
  }
  func.func @transform_2(%arg0: i32) -> (i32, i32) {
    %c0_i32 = arith.constant 0 : i32
    %c0_i32_0 = arith.constant 0 : i32
    %c0_i32_1 = arith.constant 0 : i32
    return %c0_i32, %c0_i32_0 : i32, i32
  }
  func.func @transform_3(%arg0: i32) -> (i32, i32) {
    %c0_i32 = arith.constant 0 : i32
    %c0_i32_0 = arith.constant 0 : i32
    %c0_i32_1 = arith.constant 0 : i32
    return %c0_i32, %c0_i32_0 : i32, i32
  }
  func.func @transform_4(%arg0: i32) -> (i32, i32, i32) {
    %c0_i32 = arith.constant 0 : i32
    %c0_i32_0 = arith.constant 0 : i32
    %c0_i32_1 = arith.constant 0 : i32
    %c0_i32_2 = arith.constant 0 : i32
    return %c0_i32, %c0_i32_0, %c0_i32_1 : i32, i32, i32
  }
  func.func @transform_5(%arg0: i32) -> (i32, i32, i32) {
    %c0_i32 = arith.constant 0 : i32
    %c0_i32_0 = arith.constant 0 : i32
    %c0_i32_1 = arith.constant 0 : i32
    %c0_i32_2 = arith.constant 0 : i32
    return %c0_i32, %c0_i32_0, %c0_i32_1 : i32, i32, i32
  }
  func.func @transform_6(%arg0: i32) -> (i32, i32) {
    %c0_i32 = arith.constant 0 : i32
    %c0_i32_0 = arith.constant 0 : i32
    %c0_i32_1 = arith.constant 0 : i32
    return %c0_i32, %c0_i32_0 : i32, i32
  }
  func.func @transform_7(%arg0: i32) -> (i32, i32) {
    %c0_i32 = arith.constant 0 : i32
    %c0_i32_0 = arith.constant 0 : i32
    %c0_i32_1 = arith.constant 0 : i32
    return %c0_i32, %c0_i32_0 : i32, i32
  }
  func.func @transform_8(%arg0: i32) -> (i32, i32) {
    %c0_i32 = arith.constant 0 : i32
    %c0_i32_0 = arith.constant 0 : i32
    return %arg0, %c0_i32 : i32, i32
  }
}

</mosaic_0001>

<bundles_post_ra>
// kernel: tile.15
= control target key start
LH: loop header
LB: loop body
LE: loop exit
PB: predicated region body
PF: predicated region fallthrough
CT: control target
= control target key end

     0   :  { %s34_s0 = inlined_call_operand.vmem [shape: f32[2], index: 0, kind: input, shape index: {}]   ;;  %s35_s1 = inlined_call_operand.vmem [shape: f32[20,2], index: 1, kind: output, shape index: {}]  }
   0x1   :  { %v4_v0 = vld [vmem:[%s34_s0] ss:$0 sm:$0xff] }
   0x2   :  { %5 = vst [vmem:[%s35_s1] sm:$0xff] %v4_v0  ;;  %10 = vst [vmem:[%s35_s1 + $0x8] sm:$0xff] %v4_v0 }
   0x3   :  { %11 = vst [vmem:[%s35_s1 + $0x10] sm:$0xff] %v4_v0 }

// kernel: div.1
= control target key start
LH: loop header
LB: loop body
LE: loop exit
PB: predicated region body
PF: predicated region fallthrough
CT: control target
= control target key end

     0   :  { %s37_s0 = inlined_call_operand.vmem [shape: f32[40], index: 0, kind: input, shape index: {}]   ;;  %s38_s1 = inlined_call_operand.vmem [shape: f32[40], index: 1, kind: input, shape index: {}]   ;;  %s39_s2 = inlined_call_operand.vmem [shape: f32[40], index: 2, kind: output, shape index: {}]  }
   0x1   :  { %v4_v0 = vld [vmem:[%s38_s1] sm:$0x1] }
   0x2   :  { %11 = vrcp.f32 %v4_v0  ;;  %v3_v1 = vld [vmem:[%s37_s0] sm:$0x1] }
   0xc   :  { %v12_v2 = vpop.eup %11 }
   0xd   :  { %v8_v3 = vmul.f32 %v12_v2, %v3_v1 }
   0xf   :  { %10 = vst [vmem:[%s39_s2] sm:$0x1] %v8_v3 }

// kernel: div.6
= control target key start
LH: loop header
LB: loop body
LE: loop exit
PB: predicated region body
PF: predicated region fallthrough
CT: control target
= control target key end

     0   :  { %s163_s10 = smov 38   ;;  %s164_s11 = smov 34   ;;  %vm3_vm0 = vcmask 15360   ;;  %vm9_vm1 = vcmask 326960   ;;  %vm15_vm2 = vcmask 310560   ;;  %vm21_vm3 = vcmask 294160   ;;  %s255_s0 = inlined_call_operand.vmem [shape: f32[20,2], index: 0, kind: input, shape index: {}]   ;;  %s256_s1 = inlined_call_operand.vmem [shape: f32[40], index: 1, kind: output, shape index: {}]  }
   0x1   :  { %v125_v0 = vld [vmem:[%s255_s0 + $0x13] sm:$0x1]   ;;  %v127_v1 = vld [vmem:[%s255_s0 + $0x11] sm:$0x1]   ;;  %v126_v2 = vld [vmem:[%s255_s0 + $0x12] sm:$0x1]  }
   0x2   :  { %7 = vrot.lane.b32.xlu0 %v125_v0, %s163_s10  ;;  %19 = vrot.lane.b32.xlu1 %v127_v1, %s164_s11  ;;  %v128_v3 = vld [vmem:[%s255_s0 + $0x10] sm:$0x1]   ;;  %s165_s16 = smov 36   ;;  %s166_s17 = smov 32   ;;  %v129_v4 = vld [vmem:[%s255_s0 + $0xf] sm:$0x1]  }
   0x3   :  { %v130_v5 = vld [vmem:[%s255_s0 + $0xe] sm:$0x1]   ;;  %s167_s22 = smov 30   ;;  %s168_s23 = smov 28   ;;  %v131_v6 = vld [vmem:[%s255_s0 + $0xd] sm:$0x1]  }
   0x4   :  { %v2_v7 = vld [vmem:[%s255_s0] sm:$0x1]   ;;  %v132_v8 = vld [vmem:[%s255_s0 + $0xc] sm:$0x1]   ;;  %s169_s30 = smov 26   ;;  %s170_s2 = smov 24  }
   0x5   :  { %4 = vst.msk [vmem:[#allocation0] sm:$0x1] %vm3_vm0, %v2_v7   ;;  %v133_v9 = vld [vmem:[%s255_s0 + $0xb] sm:$0x1]   ;;  %v134_v10 = vld [vmem:[%s255_s0 + $0xa] sm:$0x1]  }
   0x6   :  { %13 = vrot.lane.b32.xlu0 %v126_v2, %s165_s16  ;;  %25 = vrot.lane.b32.xlu1 %v128_v3, %s166_s17  ;;  %s171_s7 = smov 22   ;;  %s172_s8 = smov 20   ;;  %v135_v11 = vld [vmem:[%s255_s0 + $0x9] sm:$0x1]   ;;  %v136_v12 = vld [vmem:[%s255_s0 + $0x8] sm:$0x1]  }
   0x7   :  { %s173_s13 = smov 18   ;;  %s174_s14 = smov 16   ;;  %v137_v13 = vld [vmem:[%s255_s0 + $0x7] sm:$0x1]   ;;  %v138_v14 = vld [vmem:[%s255_s0 + $0x6] sm:$0x1]  }
   0x8   :  { %s175_s19 = smov 14   ;;  %s176_s20 = smov 12   ;;  %v139_v15 = vld [vmem:[%s255_s0 + $0x5] sm:$0x1]   ;;  %v140_v16 = vld [vmem:[%s255_s0 + $0x4] sm:$0x1]  }
   0x9   :  { %s177_s25 = smov 10   ;;  %s178_s26 = smov 8   ;;  %v141_v17 = vld [vmem:[%s255_s0 + $0x3] sm:$0x1]   ;;  %v142_v18 = vld [vmem:[%s255_s0 + $0x2] sm:$0x1]  }
   0xa   :  { %31 = vrot.lane.b32.xlu0 %v129_v4, %s167_s22  ;;  %37 = vrot.lane.b32.xlu1 %v130_v5, %s168_s23  ;;  %s180_s3 = smov 4   ;;  %v143_v19 = vld [vmem:[%s255_s0 + $0x1] sm:$0x1]   ;;  %s181_s0 = smov 2   ;;  %vm27_vm4 = vcmask 277760   ;;  %vm33_vm5 = vcmask 261360  }
   0xb   :  { %vm39_vm6 = vcmask 244960   ;;  %vm45_vm7 = vcmask 228560   ;;  %vm51_vm8 = vcmask 212160   ;;  %vm57_vm9 = vcmask 195760  }
   0xc   :  { %vm63_vm10 = vcmask 179360   ;;  %vm69_vm11 = vcmask 162960   ;;  %vm75_vm12 = vcmask 146560   ;;  %vm81_vm13 = vcmask 130160  }
   0xd   :  { %vm87_vm14 = vcmask 113760   ;;  %vm93_vm15 = vcmask 97360   ;;  %vm99_vm0 = vcmask 80960  }
   0xe   :  { %43 = vrot.lane.b32.xlu0 %v131_v6, %s169_s30  ;;  %49 = vrot.lane.b32.xlu1 %v132_v8, %s170_s2  ;;  %s179_s2 = smov 6  }
  0x12   :  { %55 = vrot.lane.b32.xlu0 %v133_v9, %s171_s7  ;;  %61 = vrot.lane.b32.xlu1 %v134_v10, %s172_s8 }
  0x16   :  { %67 = vrot.lane.b32.xlu0 %v135_v11, %s173_s13  ;;  %73 = vrot.lane.b32.xlu1 %v136_v12, %s174_s14 }
  0x1a   :  { %79 = vrot.lane.b32.xlu0 %v137_v13, %s175_s19  ;;  %85 = vrot.lane.b32.xlu1 %v138_v14, %s176_s20 }
  0x1e   :  { %91 = vrot.lane.b32.xlu0 %v139_v15, %s177_s25  ;;  %97 = vrot.lane.b32.xlu1 %v140_v16, %s178_s26 }
  0x22   :  { %103 = vrot.lane.b32.xlu0 %v141_v17, %s179_s2  ;;  %109 = vrot.lane.b32.xlu1 %v142_v18, %s180_s3 }
  0x26   :  { %115 = vrot.lane.b32.xlu0 %v143_v19, %s181_s0 }
  0x74   :  { %v8_v20 = vpop.permute.xlu0 %7   ;;  %v20_v21 = vpop.permute.xlu1 %19  }
  0x75   :  { %10 = vst.msk [vmem:[#allocation0] sm:$0x1] %vm9_vm1, %v8_v20   ;;  %vm105_vm1 = vcmask 64560  }
  0x78   :  { %v14_v22 = vpop.permute.xlu0 %13   ;;  %v26_v23 = vpop.permute.xlu1 %25  }
  0x79   :  { %16 = vst.msk [vmem:[#allocation0] sm:$0x1] %vm15_vm2, %v14_v22   ;;  %vm111_vm2 = vcmask 48160  }
  0x7a   :  { %22 = vst.msk [vmem:[#allocation0] sm:$0x1] %vm21_vm3, %v20_v21   ;;  %vm117_vm3 = vcmask 31760  }
  0x7b   :  { %28 = vst.msk [vmem:[#allocation0] sm:$0x1] %vm27_vm4, %v26_v23  }
  0x7c   :  { %v32_v24 = vpop.permute.xlu0 %31   ;;  %v38_v25 = vpop.permute.xlu1 %37  }
  0x7d   :  { %34 = vst.msk [vmem:[#allocation0] sm:$0x1] %vm33_vm5, %v32_v24  }
  0x7e   :  { %40 = vst.msk [vmem:[#allocation0] sm:$0x1] %vm39_vm6, %v38_v25  }
  0x80   :  { %v44_v26 = vpop.permute.xlu0 %43   ;;  %v50_v27 = vpop.permute.xlu1 %49  }
  0x81   :  { %46 = vst.msk [vmem:[#allocation0] sm:$0x1] %vm45_vm7, %v44_v26  }
  0x82   :  { %52 = vst.msk [vmem:[#allocation0] sm:$0x1] %vm51_vm8, %v50_v27  }
  0x84   :  { %v56_v28 = vpop.permute.xlu0 %55   ;;  %v62_v29 = vpop.permute.xlu1 %61  }
  0x85   :  { %58 = vst.msk [vmem:[#allocation0] sm:$0x1] %vm57_vm9, %v56_v28  }
  0x86   :  { %64 = vst.msk [vmem:[#allocation0] sm:$0x1] %vm63_vm10, %v62_v29  }
  0x88   :  { %v68_v30 = vpop.permute.xlu0 %67   ;;  %v74_v31 = vpop.permute.xlu1 %73  }
  0x89   :  { %70 = vst.msk [vmem:[#allocation0] sm:$0x1] %vm69_vm11, %v68_v30  }
  0x8a   :  { %76 = vst.msk [vmem:[#allocation0] sm:$0x1] %vm75_vm12, %v74_v31  }
  0x8c   :  { %v80_v32 = vpop.permute.xlu0 %79   ;;  %v86_v33 = vpop.permute.xlu1 %85  }
  0x8d   :  { %82 = vst.msk [vmem:[#allocation0] sm:$0x1] %vm81_vm13, %v80_v32  }
  0x8e   :  { %88 = vst.msk [vmem:[#allocation0] sm:$0x1] %vm87_vm14, %v86_v33  }
  0x90   :  { %v92_v34 = vpop.permute.xlu0 %91   ;;  %v98_v35 = vpop.permute.xlu1 %97  }
  0x91   :  { %94 = vst.msk [vmem:[#allocation0] sm:$0x1] %vm93_vm15, %v92_v34  }
  0x92   :  { %100 = vst.msk [vmem:[#allocation0] sm:$0x1] %vm99_vm0, %v98_v35  }
  0x94   :  { %v104_v36 = vpop.permute.xlu0 %103   ;;  %v110_v37 = vpop.permute.xlu1 %109  }
  0x95   :  { %106 = vst.msk [vmem:[#allocation0] sm:$0x1] %vm105_vm1, %v104_v36  }
  0x96   :  { %112 = vst.msk [vmem:[#allocation0] sm:$0x1] %vm111_vm2, %v110_v37  }
  0x98   :  { %v116_v38 = vpop.permute.xlu0 %115  }
  0x99   :  { %118 = vst.msk [vmem:[#allocation0] sm:$0x1] %vm117_vm3, %v116_v38  }
  0xa0   :  { %v122_v39 = vld [vmem:[#allocation0] sm:$0x1] }
  0xa1   :  { %124 = vst [vmem:[%s256_s1] sm:$0x1] %v122_v39 }

// kernel: mlp_planner_forward.1
= control target key start
LH: loop header
LB: loop body
LE: loop exit
PB: predicated region body
PF: predicated region fallthrough
CT: control target
= control target key end

     0   :  { %v1178_v0 = vmov 0.0|0.0   ;;  %vm1179_vm0 = vmmov 0   ;;  %v1180_v6 = vmov 0.0   ;;  %vm45_vm1 = vcmask 1043456   ;;  %s1546_s3 = inlined_call_operand.vmem [shape: f32[20,128], index: 3, kind: input, shape index: {}]   ;;  %s1547_s2 = inlined_call_operand.vmem [shape: f32[20,128], index: 2, kind: input, shape index: {}]   ;;  %s1548_s1 = inlined_call_operand.vmem [shape: f32[8,20], index: 1, kind: input, shape index: {}]   ;;  %s1549_s0 = inlined_call_operand.vmem [shape: f32[8,20], index: 0, kind: input, shape index: {}]   ;;  %s1550_s4 = inlined_call_operand.vmem [shape: f32[4,3,128], index: 4, kind: input, shape index: {}]   ;;  %s1551_s5 = inlined_call_operand.vmem [shape: f32[3,128,128], index: 5, kind: input, shape index: {}]   ;;  %s1552_s6 = inlined_call_operand.vmem [shape: f32[128,128], index: 6, kind: input, shape index: {}]   ;;  %s1553_s7 = inlined_call_operand.vmem [shape: f32[1,128], index: 7, kind: input, shape index: {}]   ;;  %s1554_s8 = inlined_call_operand.vmem [shape: f32[8,128], index: 8, kind: output, shape index: {}]  }
   0x1   :  { %1049 = vmatprep.subr.bf16.mxu0 %v1178_v0  ;;  %1052 = vmatprep.subr.bf16.mxu1 %v1178_v0  ;;  %v38_v1 = vld [vmem:[%s1546_s3] sm:$0xff]  ;;  %v39_v2 = vld [vmem:[%s1546_s3 + $0x8] sm:$0xff]  ;;  %v40_v8 = vld [vmem:[%s1546_s3 + $0x10] sm:$0xf]  ;;  %vm41_vm2 = vcmask 162816   ;;  %v195_v12 = vlaneseq }
   0x2   :  { %v34_v3 = vld [vmem:[%s1547_s2] sm:$0xff]  ;;  %v1050_v4 = vpack.c.bf16 %v39_v2, %v38_v1  ;;  %v35_v5 = vld [vmem:[%s1547_s2 + $0x8] sm:$0xff]  ;;  %897 = vmatprep.mubr.msk.f32.mxu0 %vm1179_vm0, %v1180_v6  ;;  %906 = vmatprep.mubr.msk.f32.mxu1 %vm1179_vm0, %v1180_v6  ;;  %v36_v9 = vld [vmem:[%s1547_s2 + $0x10] sm:$0xf] }
   0x3   :  { %v1053_v7 = vpack.c.bf16 %v35_v5, %v34_v3  ;;  %v37_v10 = vld [vmem:[%s1548_s1] sm:$0xff]  ;;  %v1264_v13 = vshrl.u32 %v195_v12, 7  ;;  %v253_v25 = vld [vmem:[%s1551_s5 + $0x8] sm:$0xff]  ;;  %v254_v26 = vld [vmem:[%s1551_s5 + $0x10] sm:$0xff] }
   0x4   :  { %1051 = vmatpush3.bf16.msra.mxu0 %v1050_v4  ;;  %v33_v11 = vld [vmem:[%s1549_s0] sm:$0xff]  ;;  %v255_v28 = vld [vmem:[%s1551_s5 + $0x18] sm:$0xff]  ;;  %v257_v31 = vld [vmem:[%s1551_s5 + $0x28] sm:$0xff] }
   0x5   :  { %1054 = vmatpush3.bf16.msra.mxu1 %v1053_v7  ;;  %895 = vmatprep.subr.mxu0 %v1180_v6  ;;  %v1267_v14 = vsub.s32 0, %v1264_v13  ;;  %v1272_v15 = vld [vmem:[%s1550_s4] sm:$0x7]  ;;  %v1059_v29 = vpack.c.bf16 %v255_v28, %v254_v26  ;;  %v258_v33 = vld [vmem:[%s1551_s5 + $0x30] sm:$0xff]  ;;  %v259_v34 = vld [vmem:[%s1551_s5 + $0x38] sm:$0xff]  ;;  %v1333_v55 = vsub.s32 1, %v1264_v13 }
   0x6   :  { %904 = vmatprep.subr.mxu1 %v1180_v6  ;;  %v252_v24 = vld [vmem:[%s1551_s5] sm:$0xff]  ;;  %v1065_v35 = vpack.c.bf16 %v259_v34, %v258_v33  ;;  %v261_v37 = vld [vmem:[%s1551_s5 + $0x48] sm:$0xff]  ;;  %v262_v39 = vld [vmem:[%s1551_s5 + $0x50] sm:$0xff]  ;;  %v1336_v56 = vsub.s32 2, %v1264_v13 }
   0x7   :  { %v198_v17 = vrot.slane %v1272_v15, %v1267_v14  ;;  %v1056_v27 = vpack.c.bf16 %v253_v25, %v252_v24  ;;  %v256_v30 = vld [vmem:[%s1551_s5 + $0x20] sm:$0xff]  ;;  %v263_v40 = vld [vmem:[%s1551_s5 + $0x58] sm:$0xff]  ;;  %v265_v43 = vld [vmem:[%s1551_s5 + $0x68] sm:$0xff]  ;;  %v216_v57 = vrot.slane %v1272_v15, %v1333_v55 }
   0x8   :  { %896 = vmatpush3.msk.msra.mxu0 %vm45_vm1, %v40_v8  ;;  %v1062_v32 = vpack.c.bf16 %v257_v31, %v256_v30  ;;  %v260_v36 = vld [vmem:[%s1551_s5 + $0x40] sm:$0xff]  ;;  %v1071_v41 = vpack.c.bf16 %v263_v40, %v262_v39  ;;  %v266_v45 = vld [vmem:[%s1551_s5 + $0x70] sm:$0xff]  ;;  %v267_v46 = vld [vmem:[%s1551_s5 + $0x78] sm:$0xff]  ;;  %v221_v60 = vrot.slane %v1272_v15, %v1336_v56 }
   0x9   :  { %905 = vmatpush3.msk.msra.mxu1 %vm45_vm1, %v36_v9  ;;  %898 = vmatmul.mubr.msk.f32.vlgmr.msra.gmra.mrb[0].mxu0 %vm41_vm2, %v37_v10  ;;  %v1068_v38 = vpack.c.bf16 %v261_v37, %v260_v36  ;;  %v264_v42 = vld [vmem:[%s1551_s5 + $0x60] sm:$0xff]  ;;  %v1077_v47 = vpack.c.bf16 %v267_v46, %v266_v45  ;;  %v784_v39 = vld [vmem:[%s1551_s5 + $0x90] sm:$0xff] }
   0xa   :  { %907 = vmatmul.mubr.msk.f32.vlgmr.msra.gmra.mrb[0].mxu1 %vm41_vm2, %v33_v11  ;;  %1055 = vmatprep.subr.bf16.mxu0 %v1178_v0  ;;  %v1074_v44 = vpack.c.bf16 %v265_v43, %v264_v42  ;;  %v1347_v31 = vld [vmem:[%s1550_s4 + $0x4] sm:$0x7]  ;;  %v788_v46 = vld [vmem:[%s1551_s5 + $0xb0] sm:$0xff] }
   0xb   :  { %941 = vmatprep.mubr.msk.f32.mxu0 %vm1179_vm0, %v1180_v6  ;;  %1079 = vmatprep.subr.bf16.mxu1 %v1178_v0  ;;  %v782_v37 = vld [vmem:[%s1551_s5 + $0x80] sm:$0xff] }
   0xc   :  { %976 = vmatprep.mubr.msk.f32.mxu1 %vm1179_vm0, %v1180_v6  ;;  %1057 = vmatpush3.bf16.msra.mxu0 %v1056_v27  ;;  %v786_v43 = vld [vmem:[%s1551_s5 + $0xa0] sm:$0xff] }
   0xd   :  { %1058 = vmatprep.subr.bf16.mxu0 %v1178_v0 }
  0x10   :  { %1060 = vmatpush3.bf16.msra.mxu0 %v1059_v29 }
  0x11   :  { %1061 = vmatprep.subr.bf16.mxu0 %v1178_v0 }
  0x14   :  { %1063 = vmatpush3.bf16.msra.mxu0 %v1062_v32  ;;  %v271_v32 = vrot.slane %v1347_v31, %v1267_v14 }
  0x15   :  { %1064 = vmatprep.subr.bf16.mxu0 %v1178_v0 }
  0x18   :  { %1066 = vmatpush3.bf16.msra.mxu0 %v1065_v35 }
  0x19   :  { %1067 = vmatprep.subr.bf16.mxu0 %v1178_v0 }
  0x1c   :  { %1069 = vmatpush3.bf16.msra.mxu0 %v1068_v38  ;;  %v783_v38 = vld [vmem:[%s1551_s5 + $0x88] sm:$0xff] }
  0x1d   :  { %1070 = vmatprep.subr.bf16.mxu0 %v1178_v0  ;;  %v1080_v40 = vpack.c.bf16 %v783_v38, %v782_v37 }
  0x1f   :  { %1081 = vmatpush3.bf16.msra.mxu1 %v1080_v40 }
  0x20   :  { %1072 = vmatpush3.bf16.msra.mxu0 %v1071_v41  ;;  %v785_v41 = vld [vmem:[%s1551_s5 + $0x98] sm:$0xff]  ;;  %1082 = vmatprep.subr.bf16.mxu1 %v1178_v0 }
  0x21   :  { %1073 = vmatprep.subr.bf16.mxu0 %v1178_v0  ;;  %v1083_v42 = vpack.c.bf16 %v785_v41, %v784_v39 }
  0x23   :  { %1084 = vmatpush3.bf16.msra.mxu1 %v1083_v42 }
  0x24   :  { %1075 = vmatpush3.bf16.msra.mxu0 %v1074_v44  ;;  %v787_v44 = vld [vmem:[%s1551_s5 + $0xa8] sm:$0xff]  ;;  %1085 = vmatprep.subr.bf16.mxu1 %v1178_v0 }
  0x25   :  { %1076 = vmatprep.subr.bf16.mxu0 %v1178_v0  ;;  %v1086_v45 = vpack.c.bf16 %v787_v44, %v786_v43  ;;  %v31_v44 = vld [vmem:[%s1550_s4 + $0x8] sm:$0x7] }
  0x27   :  { %1087 = vmatpush3.bf16.msra.mxu1 %v1086_v45  ;;  %v414_v45 = vrot.slane %v31_v44, %v1267_v14 }
  0x28   :  { %1078 = vmatpush3.bf16.msra.mxu0 %v1077_v47  ;;  %v789_v47 = vld [vmem:[%s1551_s5 + $0xb8] sm:$0xff]  ;;  %1088 = vmatprep.subr.bf16.mxu1 %v1178_v0 }
  0x29   :  { %1103 = vmatprep.subr.bf16.mxu0 %v1178_v0 }
  0xdc   :  { %v115_v16 = vpop.f32.mrb[0].mxu0 }
  0xdd   :  { %v191_v18 = vpop.f32.mrb[0].mxu1  ;;  %v899_v19 = vpop.f32.mrb[1].mxu0 }
  0xde   :  { %v192_v20 = vadd.f32 %v191_v18, %v115_v16  ;;  %v908_v21 = vpop.f32.mrb[1].mxu1 }
  0xe0   :  { %v199_v22 = vadd.f32 %v198_v17, %v192_v20 }
  0xe2   :  { %200 = vadd.xlane.f32.xlu0 %v199_v22  ;;  %v203_v23 = vmul.f32 %v199_v22, %v199_v22 }
  0xe6   :  { %204 = vadd.xlane.f32.xlu0 %v203_v23 }
 0x16f   :  { %v201_v48 = vpop.xlane.xlu0 %200 }
 0x170   :  { %v202_v49 = vmul.f32 0.0078125, %v201_v48  ;;  %v1089_v48 = vpack.c.bf16 %v789_v47, %v788_v46 }
 0x172   :  { %v207_v51 = vmul.f32 %v202_v49, %v202_v49  ;;  %v211_v58 = vsub.f32 %v199_v22, %v202_v49  ;;  %v790_v49 = vld [vmem:[%s1551_s5 + $0xc0] sm:$0xff]  ;;  %1090 = vmatpush3.bf16.msra.mxu1 %v1089_v48 }
 0x173   :  { %v205_v50 = vpop.xlane.xlu0 %204  ;;  %1091 = vmatprep.subr.bf16.mxu1 %v1178_v0 }
 0x174   :  { %v206_v52 = vmul.f32 0.0078125, %v205_v50  ;;  %v791_v50 = vld [vmem:[%s1551_s5 + $0xc8] sm:$0xff] }
 0x176   :  { %v208_v53 = vsub.f32 %v206_v52, %v207_v51  ;;  %v1092_v51 = vpack.c.bf16 %v791_v50, %v790_v49  ;;  %v792_v52 = vld [vmem:[%s1551_s5 + $0xd0] sm:$0xff]  ;;  %v798_v50 = vld [vmem:[%s1551_s5 + $0x100] sm:$0xff] }
 0x178   :  { %v209_v54 = vadd.f32 1e-05, %v208_v53  ;;  %v793_v53 = vld [vmem:[%s1551_s5 + $0xd8] sm:$0xff]  ;;  %1093 = vmatpush3.bf16.msra.mxu1 %v1092_v51  ;;  %v800_v51 = vld [vmem:[%s1551_s5 + $0x110] sm:$0xff] }
 0x179   :  { %1094 = vmatprep.subr.bf16.mxu1 %v1178_v0 }
 0x17a   :  { %1154 = vrsqrt.f32 %v209_v54  ;;  %v1095_v54 = vpack.c.bf16 %v793_v53, %v792_v52  ;;  %v801_v53 = vld [vmem:[%s1551_s5 + $0x118] sm:$0xff] }
 0x17c   :  { %1096 = vmatpush3.bf16.msra.mxu1 %v1095_v54  ;;  %v1107_v54 = vpack.c.bf16 %v801_v53, %v800_v51 }
 0x17d   :  { %1097 = vmatprep.subr.bf16.mxu1 %v1178_v0 }
 0x184   :  { %v1155_v59 = vpop.eup %1154 }
 0x185   :  { %v212_v61 = vmul.f32 %v1155_v59, %v211_v58  ;;  %v795_v58 = vld [vmem:[%s1551_s5 + $0xe8] sm:$0xff] }
 0x187   :  { %v217_v62 = vmul.f32 %v216_v57, %v212_v61  ;;  %v794_v57 = vld [vmem:[%s1551_s5 + $0xe0] sm:$0xff]  ;;  %v797_v61 = vld [vmem:[%s1551_s5 + $0xf8] sm:$0xff] }
 0x188   :  { %v1098_v59 = vpack.c.bf16 %v795_v58, %v794_v57  ;;  %v802_v57 = vld [vmem:[%s1551_s5 + $0x120] sm:$0xff]  ;;  %v803_v58 = vld [vmem:[%s1551_s5 + $0x128] sm:$0xff] }
 0x189   :  { %v222_v63 = vadd.f32 %v221_v60, %v217_v62  ;;  %v796_v60 = vld [vmem:[%s1551_s5 + $0xf0] sm:$0xff] }
 0x18a   :  { %1099 = vmatpush3.bf16.msra.mxu1 %v1098_v59  ;;  %v1101_v62 = vpack.c.bf16 %v797_v61, %v796_v60  ;;  %v1110_v59 = vpack.c.bf16 %v803_v58, %v802_v57  ;;  %v804_v60 = vld [vmem:[%s1551_s5 + $0x130] sm:$0xff]  ;;  %v805_v61 = vld [vmem:[%s1551_s5 + $0x138] sm:$0xff]  ;;  %v1477_v57 = vld [vmem:[%s1550_s4 + $0xc] sm:$0x7] }
 0x18b   :  { %v224_v1 = vmul.f32 0.70710677, %v222_v63  ;;  %v223_v28 = vmul.f32 0.5, %v222_v63  ;;  %1100 = vmatprep.subr.bf16.mxu1 %v1178_v0  ;;  %v557_v58 = vrot.slane %v1477_v57, %v1267_v14  ;;  %v683_v14 = vld [vmem:[%s1552_s6 + $0x18] sm:$0xff] }
 0x18d   :  { %v225_v2 = vand.u32 2147483647, %v224_v1  ;;  %vm247_vm3 = vcmp.ge.f32.partialorder %v224_v1, 0.0 }
 0x18e   :  { %1102 = vmatpush3.bf16.msra.mxu1 %v1101_v62  ;;  %v1113_v62 = vpack.c.bf16 %v805_v61, %v804_v60 }
 0x18f   :  { %v226_v3 = vmul.f32 0.3275911, %v225_v2  ;;  %v241_v8 = vsub.f32 0.0, %v225_v2  ;;  %1127 = vmatprep.subr.bf16.mxu1 %v1178_v0 }
 0x191   :  { %v227_v4 = vadd.f32 1.0, %v226_v3  ;;  %v242_v11 = vmul.f32 %v241_v8, %v225_v2  ;;  %v358_v8 = vrot.slane %v1347_v31, %v1333_v55 }
 0x193   :  { %1156 = vrcp.f32 %v227_v4  ;;  %v243_v16 = vmul.f32 1.442695, %v242_v11  ;;  %v363_v11 = vrot.slane %v1347_v31, %v1336_v56 }
 0x195   :  { %1158 = vpow2.f32 %v243_v16 }
 0x19d   :  { %v1157_v5 = vpop.eup %1156 }
 0x19e   :  { %v229_v7 = vmul.f32 %v1157_v5, %v227_v4 }
 0x19f   :  { %v1159_v23 = vpop.eup %1158 }
 0x1a0   :  { %v230_v9 = vsub.f32 2.0, %v229_v7 }
 0x1a2   :  { %v231_v10 = vmul.f32 %v1157_v5, %v230_v9 }
 0x1a4   :  { %v232_v12 = vmul.f32 1.0614054, %v231_v10 }
 0x1a6   :  { %v233_v13 = vadd.f32 -1.4531521, %v232_v12 }
 0x1a8   :  { %v234_v17 = vmul.f32 %v233_v13, %v231_v10 }
 0x1aa   :  { %v235_v18 = vadd.f32 1.4214138, %v234_v17 }
 0x1ac   :  { %v236_v15 = vmul.f32 %v235_v18, %v231_v10 }
 0x1ae   :  { %v237_v19 = vadd.f32 -0.28449672, %v236_v15 }
 0x1b0   :  { %v238_v20 = vmul.f32 %v237_v19, %v231_v10 }
 0x1b2   :  { %v239_v21 = vadd.f32 0.2548296, %v238_v20 }
 0x1b4   :  { %v240_v22 = vmul.f32 %v239_v21, %v231_v10 }
 0x1b6   :  { %v245_v24 = vmul.f32 %v1159_v23, %v240_v22 }
 0x1b8   :  { %v246_v25 = vsub.f32 1.0, %v245_v24 }
 0x1ba   :  { %v248_v26 = vsub.f32 0.0, %v246_v25 }
 0x1bc   :  { %v249_v27 = vsel %vm247_vm3, %v246_v25, %v248_v26 }
 0x1bd   :  { %v250_v29 = vadd.f32 1.0, %v249_v27 }
 0x1bf   :  { %v251_v30 = vmul.f32 %v250_v29, %v223_v28 }
 0x1c1   :  { %942 = vmatmul.mubr.f32.vlgmr.msra.gmra.mrb[2].mxu0 %v251_v30 }
 0x1c2   :  { %1011 = vmatprep.mubr.msk.f32.mxu0 %vm1179_vm0, %v1180_v6 }
 0x294   :  { %v338_v33 = vpop.f32.mrb[2].mxu0 }
 0x295   :  { %v339_v34 = vadd.f32 %v338_v33, %v271_v32  ;;  %v943_v35 = vpop.f32.mrb[3].mxu0 }
 0x297   :  { %342 = vadd.xlane.f32.xlu1 %v339_v34  ;;  %v345_v36 = vmul.f32 %v339_v34, %v339_v34 }
 0x29b   :  { %346 = vadd.xlane.f32.xlu1 %v345_v36 }
 0x324   :  { %v343_v63 = vpop.xlane.xlu1 %342 }
 0x325   :  { %v344_v1 = vmul.f32 0.0078125, %v343_v63  ;;  %v806_v63 = vld [vmem:[%s1551_s5 + $0x140] sm:$0xff] }
 0x327   :  { %v349_v3 = vmul.f32 %v344_v1, %v344_v1  ;;  %v353_v9 = vsub.f32 %v339_v34, %v344_v1  ;;  %v807_v1 = vld [vmem:[%s1551_s5 + $0x148] sm:$0xff] }
 0x328   :  { %v347_v2 = vpop.xlane.xlu1 %346 }
 0x329   :  { %v348_v4 = vmul.f32 0.0078125, %v347_v2  ;;  %v1116_v2 = vpack.c.bf16 %v807_v1, %v806_v63  ;;  %v680_v63 = vld [vmem:[%s1552_s6] sm:$0xff]  ;;  %v681_v1 = vld [vmem:[%s1552_s6 + $0x8] sm:$0xff] }
 0x32b   :  { %v350_v5 = vsub.f32 %v348_v4, %v349_v3  ;;  %v808_v3 = vld [vmem:[%s1551_s5 + $0x150] sm:$0xff]  ;;  %v809_v4 = vld [vmem:[%s1551_s5 + $0x158] sm:$0xff] }
 0x32d   :  { %v351_v7 = vadd.f32 1e-05, %v350_v5  ;;  %v1119_v5 = vpack.c.bf16 %v809_v4, %v808_v3  ;;  %v1128_v3 = vpack.c.bf16 %v681_v1, %v680_v63 }
 0x32f   :  { %1160 = vrsqrt.f32 %v351_v7  ;;  %v810_v7 = vld [vmem:[%s1551_s5 + $0x160] sm:$0xff] }
 0x339   :  { %v1161_v10 = vpop.eup %1160 }
 0x33a   :  { %v354_v12 = vmul.f32 %v1161_v10, %v353_v9  ;;  %v812_v10 = vld [vmem:[%s1551_s5 + $0x170] sm:$0xff] }
 0x33c   :  { %v359_v13 = vmul.f32 %v358_v8, %v354_v12  ;;  %v811_v8 = vld [vmem:[%s1551_s5 + $0x168] sm:$0xff] }
 0x33d   :  { %v1122_v9 = vpack.c.bf16 %v811_v8, %v810_v7  ;;  %v685_v7 = vld [vmem:[%s1552_s6 + $0x28] sm:$0xff] }
 0x33e   :  { %v364_v16 = vadd.f32 %v363_v11, %v359_v13  ;;  %v813_v11 = vld [vmem:[%s1551_s5 + $0x178] sm:$0xff] }
 0x33f   :  { %v1125_v12 = vpack.c.bf16 %v813_v11, %v812_v10  ;;  %v687_v10 = vld [vmem:[%s1552_s6 + $0x38] sm:$0xff] }
 0x340   :  { %v366_v17 = vmul.f32 0.70710677, %v364_v16  ;;  %v365_v41 = vmul.f32 0.5, %v364_v16 }
 0x342   :  { %v367_v18 = vand.u32 2147483647, %v366_v17  ;;  %vm389_vm4 = vcmp.ge.f32.partialorder %v366_v17, 0.0 }
 0x344   :  { %v368_v15 = vmul.f32 0.3275911, %v367_v18  ;;  %v383_v22 = vsub.f32 0.0, %v367_v18 }
 0x346   :  { %v369_v19 = vadd.f32 1.0, %v368_v15  ;;  %v384_v25 = vmul.f32 %v383_v22, %v367_v18 }
 0x348   :  { %1162 = vrcp.f32 %v369_v19  ;;  %v385_v28 = vmul.f32 1.442695, %v384_v25 }
 0x34a   :  { %1164 = vpow2.f32 %v385_v28 }
 0x352   :  { %v1163_v20 = vpop.eup %1162 }
 0x353   :  { %v371_v21 = vmul.f32 %v1163_v20, %v369_v19 }
 0x354   :  { %v1165_v36 = vpop.eup %1164 }
 0x355   :  { %v372_v23 = vsub.f32 2.0, %v371_v21  ;;  %v501_v21 = vrot.slane %v31_v44, %v1333_v55 }
 0x357   :  { %v373_v24 = vmul.f32 %v1163_v20, %v372_v23 }
 0x359   :  { %v374_v26 = vmul.f32 1.0614054, %v373_v24 }
 0x35b   :  { %v375_v27 = vadd.f32 -1.4531521, %v374_v26 }
 0x35d   :  { %v376_v29 = vmul.f32 %v375_v27, %v373_v24 }
 0x35f   :  { %v377_v30 = vadd.f32 1.4214138, %v376_v29 }
 0x361   :  { %v378_v31 = vmul.f32 %v377_v30, %v373_v24 }
 0x363   :  { %v379_v32 = vadd.f32 -0.28449672, %v378_v31 }
 0x365   :  { %v380_v33 = vmul.f32 %v379_v32, %v373_v24 }
 0x367   :  { %v381_v34 = vadd.f32 0.2548296, %v380_v33 }
 0x369   :  { %v382_v35 = vmul.f32 %v381_v34, %v373_v24  ;;  %v506_v24 = vrot.slane %v31_v44, %v1336_v56 }
 0x36b   :  { %v387_v37 = vmul.f32 %v1165_v36, %v382_v35 }
 0x36d   :  { %v388_v38 = vsub.f32 1.0, %v387_v37 }
 0x36f   :  { %v390_v39 = vsub.f32 0.0, %v388_v38 }
 0x371   :  { %v391_v40 = vsel %vm389_vm4, %v388_v38, %v390_v39 }
 0x372   :  { %v392_v42 = vadd.f32 1.0, %v391_v40 }
 0x374   :  { %v393_v43 = vmul.f32 %v392_v42, %v365_v41 }
 0x376   :  { %977 = vmatmul.mubr.f32.vlgmr.msra.gmra.mrb[2].mxu1 %v393_v43 }
 0x377   :  { %1046 = vmatprep.mubr.msk.f32.mxu1 %vm1179_vm0, %v1180_v6  ;;  %v799_v6 = vld [vmem:[%s1551_s5 + $0x108] sm:$0xff]  ;;  %1129 = vmatpush3.bf16.msra.mxu1 %v1128_v3 }
 0x378   :  { %v1104_v52 = vpack.c.bf16 %v799_v6, %v798_v50  ;;  %1130 = vmatprep.subr.bf16.mxu1 %v1178_v0 }
 0x37a   :  { %1105 = vmatpush3.bf16.msra.mxu0 %v1104_v52 }
 0x37b   :  { %1106 = vmatprep.subr.bf16.mxu0 %v1178_v0 }
 0x37e   :  { %1108 = vmatpush3.bf16.msra.mxu0 %v1107_v54 }
 0x37f   :  { %1109 = vmatprep.subr.bf16.mxu0 %v1178_v0 }
 0x382   :  { %1111 = vmatpush3.bf16.msra.mxu0 %v1110_v59 }
 0x383   :  { %1112 = vmatprep.subr.bf16.mxu0 %v1178_v0 }
 0x386   :  { %1114 = vmatpush3.bf16.msra.mxu0 %v1113_v62 }
 0x387   :  { %1115 = vmatprep.subr.bf16.mxu0 %v1178_v0 }
 0x38a   :  { %1117 = vmatpush3.bf16.msra.mxu0 %v1116_v2  ;;  %v682_v2 = vld [vmem:[%s1552_s6 + $0x10] sm:$0xff] }
 0x38b   :  { %1118 = vmatprep.subr.bf16.mxu0 %v1178_v0  ;;  %v1131_v4 = vpack.c.bf16 %v683_v14, %v682_v2  ;;  %v814_v2 = vld [vmem:[%s1553_s7] ss:$0 sm:$0xff] }
 0x38d   :  { %1132 = vmatpush3.bf16.msra.mxu1 %v1131_v4 }
 0x38e   :  { %1120 = vmatpush3.bf16.msra.mxu0 %v1119_v5  ;;  %v684_v5 = vld [vmem:[%s1552_s6 + $0x20] sm:$0xff]  ;;  %1133 = vmatprep.subr.bf16.mxu1 %v1178_v0 }
 0x38f   :  { %1121 = vmatprep.subr.bf16.mxu0 %v1178_v0  ;;  %v1134_v8 = vpack.c.bf16 %v685_v7, %v684_v5 }
 0x391   :  { %1135 = vmatpush3.bf16.msra.mxu1 %v1134_v8 }
 0x392   :  { %1123 = vmatpush3.bf16.msra.mxu0 %v1122_v9  ;;  %v686_v9 = vld [vmem:[%s1552_s6 + $0x30] sm:$0xff]  ;;  %1136 = vmatprep.subr.bf16.mxu1 %v1178_v0 }
 0x393   :  { %1124 = vmatprep.subr.bf16.mxu0 %v1178_v0  ;;  %v1137_v11 = vpack.c.bf16 %v687_v10, %v686_v9 }
 0x395   :  { %1138 = vmatpush3.bf16.msra.mxu1 %v1137_v11 }
 0x396   :  { %1126 = vmatpush3.bf16.msra.mxu0 %v1125_v12  ;;  %v688_v12 = vld [vmem:[%s1552_s6 + $0x40] sm:$0xff]  ;;  %1139 = vmatprep.subr.bf16.mxu1 %v1178_v0 }
 0x449   :  { %v481_v46 = vpop.f32.mrb[2].mxu1 }
 0x44a   :  { %v482_v47 = vadd.f32 %v481_v46, %v414_v45  ;;  %v978_v48 = vpop.f32.mrb[3].mxu1 }
 0x44c   :  { %485 = vadd.xlane.f32.xlu0 %v482_v47  ;;  %v488_v49 = vmul.f32 %v482_v47, %v482_v47 }
 0x44e   :  { %489 = vadd.xlane.f32.xlu1 %v488_v49 }
 0x4d9   :  { %v486_v13 = vpop.xlane.xlu0 %485 }
 0x4da   :  { %v487_v16 = vmul.f32 0.0078125, %v486_v13  ;;  %v689_v13 = vld [vmem:[%s1552_s6 + $0x48] sm:$0xff] }
 0x4db   :  { %v490_v17 = vpop.xlane.xlu1 %489 }
 0x4dc   :  { %v492_v18 = vmul.f32 %v487_v16, %v487_v16  ;;  %v491_v15 = vmul.f32 0.0078125, %v490_v17  ;;  %v496_v22 = vsub.f32 %v482_v47, %v487_v16  ;;  %v1140_v16 = vpack.c.bf16 %v689_v13, %v688_v12  ;;  %v690_v17 = vld [vmem:[%s1552_s6 + $0x50] sm:$0xff] }
 0x4de   :  { %v493_v19 = vsub.f32 %v491_v15, %v492_v18  ;;  %v691_v18 = vld [vmem:[%s1552_s6 + $0x58] sm:$0xff]  ;;  %1141 = vmatpush3.bf16.msra.mxu1 %v1140_v16 }
 0x4df   :  { %v1143_v15 = vpack.c.bf16 %v691_v18, %v690_v17  ;;  %1142 = vmatprep.subr.bf16.mxu1 %v1178_v0 }
 0x4e0   :  { %v494_v20 = vadd.f32 1e-05, %v493_v19  ;;  %v692_v19 = vld [vmem:[%s1552_s6 + $0x60] sm:$0xff] }
 0x4e2   :  { %1166 = vrsqrt.f32 %v494_v20  ;;  %v693_v20 = vld [vmem:[%s1552_s6 + $0x68] sm:$0xff]  ;;  %1144 = vmatpush3.bf16.msra.mxu1 %v1143_v15 }
 0x4e3   :  { %1145 = vmatprep.subr.bf16.mxu1 %v1178_v0 }
 0x4ec   :  { %v1167_v23 = vpop.eup %1166 }
 0x4ed   :  { %v497_v25 = vmul.f32 %v1167_v23, %v496_v22  ;;  %v694_v22 = vld [vmem:[%s1552_s6 + $0x70] sm:$0xff]  ;;  %v695_v23 = vld [vmem:[%s1552_s6 + $0x78] sm:$0xff] }
 0x4ef   :  { %v502_v26 = vmul.f32 %v501_v21, %v497_v25  ;;  %v1146_v21 = vpack.c.bf16 %v693_v20, %v692_v19 }
 0x4f1   :  { %v507_v27 = vadd.f32 %v506_v24, %v502_v26  ;;  %1147 = vmatpush3.bf16.msra.mxu1 %v1146_v21  ;;  %v1149_v24 = vpack.c.bf16 %v695_v23, %v694_v22 }
 0x4f2   :  { %1148 = vmatprep.subr.bf16.mxu1 %v1178_v0 }
 0x4f3   :  { %v509_v28 = vmul.f32 0.70710677, %v507_v27  ;;  %v508_v52 = vmul.f32 0.5, %v507_v27 }
 0x4f5   :  { %v510_v29 = vand.u32 2147483647, %v509_v28  ;;  %vm532_vm5 = vcmp.ge.f32.partialorder %v509_v28, 0.0  ;;  %1150 = vmatpush3.bf16.msra.mxu1 %v1149_v24 }
 0x4f7   :  { %v511_v30 = vmul.f32 0.3275911, %v510_v29  ;;  %v526_v34 = vsub.f32 0.0, %v510_v29 }
 0x4f9   :  { %v512_v31 = vadd.f32 1.0, %v511_v30  ;;  %v527_v37 = vmul.f32 %v526_v34, %v510_v29 }
 0x4fb   :  { %1168 = vrcp.f32 %v512_v31  ;;  %v528_v40 = vmul.f32 1.442695, %v527_v37 }
 0x4fd   :  { %1170 = vpow2.f32 %v528_v40 }
 0x505   :  { %v1169_v32 = vpop.eup %1168 }
 0x506   :  { %v514_v33 = vmul.f32 %v1169_v32, %v512_v31 }
 0x507   :  { %v1171_v48 = vpop.eup %1170 }
 0x508   :  { %v515_v35 = vsub.f32 2.0, %v514_v33 }
 0x50a   :  { %v516_v36 = vmul.f32 %v1169_v32, %v515_v35  ;;  %v644_v32 = vrot.slane %v1477_v57, %v1333_v55  ;;  %v649_v35 = vrot.slane %v1477_v57, %v1336_v56 }
 0x50c   :  { %v517_v38 = vmul.f32 1.0614054, %v516_v36 }
 0x50e   :  { %v518_v39 = vadd.f32 -1.4531521, %v517_v38 }
 0x510   :  { %v519_v41 = vmul.f32 %v518_v39, %v516_v36 }
 0x512   :  { %v520_v42 = vadd.f32 1.4214138, %v519_v41 }
 0x514   :  { %v521_v43 = vmul.f32 %v520_v42, %v516_v36 }
 0x516   :  { %v522_v44 = vadd.f32 -0.28449672, %v521_v43 }
 0x518   :  { %v523_v45 = vmul.f32 %v522_v44, %v516_v36 }
 0x51a   :  { %v524_v46 = vadd.f32 0.2548296, %v523_v45 }
 0x51c   :  { %v525_v47 = vmul.f32 %v524_v46, %v516_v36 }
 0x51e   :  { %v530_v49 = vmul.f32 %v1171_v48, %v525_v47 }
 0x520   :  { %v531_v50 = vsub.f32 1.0, %v530_v49 }
 0x522   :  { %v533_v6 = vsub.f32 0.0, %v531_v50 }
 0x524   :  { %v534_v51 = vsel %vm532_vm5, %v531_v50, %v533_v6 }
 0x525   :  { %v535_v53 = vadd.f32 1.0, %v534_v51 }
 0x527   :  { %v536_v54 = vmul.f32 %v535_v53, %v508_v52 }
 0x529   :  { %1012 = vmatmul.mubr.f32.vlgmr.msra.gmra.mrb[4].mxu0 %v536_v54 }
 0x5fc   :  { %v624_v59 = vpop.f32.mrb[4].mxu0 }
 0x5fd   :  { %v625_v60 = vadd.f32 %v624_v59, %v557_v58  ;;  %v1013_v61 = vpop.f32.mrb[5].mxu0 }
 0x5ff   :  { %628 = vadd.xlane.f32.xlu0 %v625_v60  ;;  %v631_v62 = vmul.f32 %v625_v60, %v625_v60 }
 0x601   :  { %632 = vadd.xlane.f32.xlu1 %v631_v62 }
 0x68c   :  { %v629_v25 = vpop.xlane.xlu0 %628 }
 0x68d   :  { %v630_v26 = vmul.f32 0.0078125, %v629_v25 }
 0x68e   :  { %v633_v27 = vpop.xlane.xlu1 %632 }
 0x68f   :  { %v635_v28 = vmul.f32 %v630_v26, %v630_v26  ;;  %v634_v29 = vmul.f32 0.0078125, %v633_v27  ;;  %v639_v33 = vsub.f32 %v625_v60, %v630_v26 }
 0x691   :  { %v636_v30 = vsub.f32 %v634_v29, %v635_v28 }
 0x693   :  { %v637_v31 = vadd.f32 1e-05, %v636_v30 }
 0x695   :  { %1172 = vrsqrt.f32 %v637_v31 }
 0x69f   :  { %v1173_v34 = vpop.eup %1172 }
 0x6a0   :  { %v640_v36 = vmul.f32 %v1173_v34, %v639_v33 }
 0x6a2   :  { %v645_v37 = vmul.f32 %v644_v32, %v640_v36 }
 0x6a4   :  { %v650_v0 = vadd.f32 %v649_v35, %v645_v37 }
 0x6a6   :  { %v652_v38 = vmul.f32 0.70710677, %v650_v0  ;;  %v651_v62 = vmul.f32 0.5, %v650_v0 }
 0x6a8   :  { %v653_v39 = vand.u32 2147483647, %v652_v38  ;;  %vm675_vm6 = vcmp.ge.f32.partialorder %v652_v38, 0.0 }
 0x6aa   :  { %v654_v40 = vmul.f32 0.3275911, %v653_v39  ;;  %v669_v44 = vsub.f32 0.0, %v653_v39 }
 0x6ac   :  { %v655_v41 = vadd.f32 1.0, %v654_v40  ;;  %v670_v47 = vmul.f32 %v669_v44, %v653_v39 }
 0x6ae   :  { %1174 = vrcp.f32 %v655_v41  ;;  %v671_v49 = vmul.f32 1.442695, %v670_v47 }
 0x6b0   :  { %1176 = vpow2.f32 %v671_v49 }
 0x6b8   :  { %v1175_v42 = vpop.eup %1174 }
 0x6b9   :  { %v657_v43 = vmul.f32 %v1175_v42, %v655_v41 }
 0x6ba   :  { %v1177_v57 = vpop.eup %1176 }
 0x6bb   :  { %v658_v45 = vsub.f32 2.0, %v657_v43 }
 0x6bd   :  { %v659_v46 = vmul.f32 %v1175_v42, %v658_v45 }
 0x6bf   :  { %v660_v55 = vmul.f32 1.0614054, %v659_v46 }
 0x6c1   :  { %v661_v48 = vadd.f32 -1.4531521, %v660_v55 }
 0x6c3   :  { %v662_v50 = vmul.f32 %v661_v48, %v659_v46 }
 0x6c5   :  { %v663_v6 = vadd.f32 1.4214138, %v662_v50 }
 0x6c7   :  { %v664_v56 = vmul.f32 %v663_v6, %v659_v46 }
 0x6c9   :  { %v665_v51 = vadd.f32 -0.28449672, %v664_v56 }
 0x6cb   :  { %v666_v52 = vmul.f32 %v665_v51, %v659_v46 }
 0x6cd   :  { %v667_v53 = vadd.f32 0.2548296, %v666_v52 }
 0x6cf   :  { %v668_v54 = vmul.f32 %v667_v53, %v659_v46 }
 0x6d1   :  { %v673_v58 = vmul.f32 %v1177_v57, %v668_v54 }
 0x6d3   :  { %v674_v59 = vsub.f32 1.0, %v673_v58 }
 0x6d5   :  { %v676_v60 = vsub.f32 0.0, %v674_v59 }
 0x6d7   :  { %v677_v61 = vsel %vm675_vm6, %v674_v59, %v676_v60 }
 0x6d8   :  { %v678_v63 = vadd.f32 1.0, %v677_v61 }
 0x6da   :  { %v679_v1 = vmul.f32 %v678_v63, %v651_v62 }
 0x6dc   :  { %1047 = vmatmul.mubr.f32.vlgmr.msra.gmra.mrb[4].mxu1 %v679_v1 }
 0x7af   :  { %v769_v3 = vpop.f32.mrb[4].mxu1 }
 0x7b0   :  { %v770_v14 = vadd.f32 %v814_v2, %v769_v3  ;;  %v1048_v4 = vpop.f32.mrb[5].mxu1 }
 0x7b2   :  { %773 = vst [vmem:[%s1554_s8] sm:$0xff] %v770_v14 }

</bundles_post_ra>
